<compile_context>
chip_gen: v6e
topology: v6e:2x2x1
jax: 0.10.0
libtpu: 0.0.40
codegen_flags: <defaults>
</compile_context>

<pallas_src>
import functools

import jax
import jax.numpy as jnp
from jax.experimental import pallas as pl
from jax.experimental.pallas import tpu as pltpu

_LANE = 128      # vreg lane width (last dim)
_SUBLANE = 8     # vreg sublane width (second-to-last dim)


def _round_up(x, m):
    return ((x + m - 1) // m) * m


@functools.lru_cache(maxsize=1)
def _single_buffer_supported():
    """Probe whether pipeline_mode=pl.Buffered(1) lowers, runs, and is correct here."""
    try:
        def _probe_kernel(x_ref, w_ref, o_ref):
            o_ref[...] = x_ref[...] + w_ref[...]

        w_spec = pl.BlockSpec((8, 128), lambda i: (0, 0), pipeline_mode=pl.Buffered(1))
        fn = pl.pallas_call(
            _probe_kernel,
            out_shape=jax.ShapeDtypeStruct((16, 128), jnp.float32),
            grid_spec=pltpu.PrefetchScalarGridSpec(
                num_scalar_prefetch=0,
                grid=(2,),
                in_specs=[pl.BlockSpec((8, 128), lambda i: (i, 0)), w_spec],
                out_specs=pl.BlockSpec((8, 128), lambda i: (i, 0)),
            ),
            compiler_params=pltpu.CompilerParams(dimension_semantics=("parallel",)),
        )
        out = fn(jnp.zeros((16, 128), jnp.float32), jnp.ones((8, 128), jnp.float32))
        out = jax.block_until_ready(out)
        return bool(jnp.allclose(out, 1.0))
    except Exception:
        return False


@functools.lru_cache(maxsize=1)
def _vmem_budget_bytes():
    """Generation-aware VMEM budget: ~75% of per-core VMEM capacity."""
    try:
        info = pltpu.get_tpu_info()
        cap = int(info.vmem_capacity_bytes)
        if cap > 0:
            return (cap * 3) // 4      # ~48 MiB on v7x (64 MiB/TC), ~96 MiB on v5e/v6e (128 MiB)
    except Exception:
        pass
    return 40 * 1024 * 1024            # conservative fallback, safe on every generation


def _const_spec(shape):
    """BlockSpec for a grid-invariant operand (weights / stacked biases): full-array block."""
    idx = lambda i: (0,) * len(shape)
    if _single_buffer_supported():
        # Block index never changes across the grid -> single-buffer to halve resident VMEM.
        return pl.BlockSpec(shape, idx, pipeline_mode=pl.Buffered(1))
    return pl.BlockSpec(shape, idx)


def _autoencoder_kernel(n_enc, n_dec, use_bf16, *refs):
    """Fused encoder+decoder over one row tile, run for both edge_to and edge_from.

    refs = (x_to, x_from, w_0..w_{L-1}, bias_stack,
            umap_to, umap_from, recon_to, recon_from)
    ReLU after every Linear except the last of each stack (matches nn.Sequential).
    """
    n_layers = n_enc + n_dec
    x_to_ref, x_from_ref = refs[0], refs[1]
    w_refs = refs[2:2 + n_layers]
    b_ref = refs[2 + n_layers]
    umap_to_ref, umap_from_ref, recon_to_ref, recon_from_ref = refs[3 + n_layers:3 + n_layers + 4]

    def linear(h, layer, relu):
        w = w_refs[layer][...]
        ow = w.shape[-1]
        b = b_ref[layer:layer + 1, 0:ow].astype(jnp.float32)
        if use_bf16:
            y = jnp.dot(h.astype(jnp.bfloat16), w.astype(jnp.bfloat16),
                        preferred_element_type=jnp.float32)
        else:
            y = jnp.dot(h.astype(jnp.float32), w.astype(jnp.float32),
                        preferred_element_type=jnp.float32)
        y = y + b
        return jnp.maximum(y, 0.0) if relu else y

    def run_mlp(x_ref, umap_ref, recon_ref):
        # Encoder — the (lane-padded) embedding never leaves vregs/VMEM.
        h = x_ref[...].astype(jnp.float32)
        for i in range(n_enc):
            h = linear(h, i, relu=(i < n_enc - 1))
        umap_ref[...] = h[:, :umap_ref.shape[-1]].astype(umap_ref.dtype)
        # Decoder consumes the in-register embedding. Padded embedding lanes are exactly zero
        # (zero-padded last-encoder-layer cols + bias) and the matching decoder weight rows are
        # zero, so the padding is mathematically inert.
        for j in range(n_dec):
            h = linear(h, n_enc + j, relu=(j < n_dec - 1))
        recon_ref[...] = h[:, :recon_ref.shape[-1]].astype(recon_ref.dtype)

    run_mlp(x_to_ref, umap_to_ref, recon_to_ref)
    run_mlp(x_from_ref, umap_from_ref, recon_from_ref)


def _fused_forward(edge_to, edge_from, weights_p, bias_stack, n_enc, n_dec,
                   tile_rows, d_out, use_bf16, vmem_limit):
    """One pallas_call: (N, d_in) x2 -> (umap_to, umap_from, recon_to, recon_from)."""
    n, d_in = edge_to.shape
    grid = (pl.cdiv(n, tile_rows),)

    def row_spec(width):
        return pl.BlockSpec((tile_rows, width), lambda i: (i, 0))

    in_specs = [row_spec(d_in), row_spec(d_in)]
    for w in weights_p:
        in_specs.append(_const_spec(tuple(int(s) for s in w.shape)))
    in_specs.append(_const_spec(tuple(int(s) for s in bias_stack.shape)))

    out_specs = [row_spec(d_out), row_spec(d_out), row_spec(d_in), row_spec(d_in)]
    out_shape = (
        jax.ShapeDtypeStruct((n, d_out), jnp.float32),
        jax.ShapeDtypeStruct((n, d_out), jnp.float32),
        jax.ShapeDtypeStruct((n, d_in), jnp.float32),
        jax.ShapeDtypeStruct((n, d_in), jnp.float32),
    )

    # Advisory cost hint: 2 inputs (to/from), 2 flops per MAC, f32 bytes in/out + weights.
    flops = 2 * 2 * int(n) * sum(int(w.shape[0]) * int(w.shape[1]) for w in weights_p)
    bytes_accessed = 4 * (2 * int(n) * int(d_in)
                          + 2 * int(n) * (int(d_out) + int(d_in))
                          + sum(int(w.size) for w in weights_p) + int(bias_stack.size))

    kernel = functools.partial(_autoencoder_kernel, n_enc, n_dec, use_bf16)
    return pl.pallas_call(
        kernel,
        out_shape=out_shape,
        grid_spec=pltpu.PrefetchScalarGridSpec(
            num_scalar_prefetch=0,
            grid=grid,
            in_specs=in_specs,
            out_specs=out_specs,
        ),
        compiler_params=pltpu.CompilerParams(
            # Row tiles are independent -> shard the batch axis across v7x's 2 TensorCores.
            dimension_semantics=("parallel",),
            vmem_limit_bytes=int(vmem_limit),
        ),
        cost_estimate=pl.CostEstimate(
            flops=int(flops), transcendentals=0, bytes_accessed=int(bytes_accessed)),
    )(edge_to, edge_from, *weights_p, bias_stack)


def _init_linear(key, fan_in, fan_out):
    """nn.Linear-style init: U(-1/sqrt(fan_in), 1/sqrt(fan_in)), (in, out) layout."""
    kw, kb = jax.random.split(key)
    bound = 1.0 / jnp.sqrt(jnp.float32(fan_in))
    w = jax.random.uniform(kw, (fan_in, fan_out), jnp.float32, -bound, bound)
    b = jax.random.uniform(kb, (1, fan_out), jnp.float32, -bound, bound)
    return w, b


class SingleVisualizationModelPallas:
    def __init__(self, input_dims, output_dims, units, hidden_layer=3, key=None, use_bf16=False):
        self.input_dims = int(input_dims)
        self.output_dims = int(output_dims)
        self.units = int(units)
        self.hidden_layer = int(hidden_layer)
        self.use_bf16 = bool(use_bf16)
        if key is None:
            key = jax.random.PRNGKey(0)

        # encoder: in->U, (U->U)*hidden, U->out ; decoder: out->U, (U->U)*hidden, U->in
        enc_dims = ([(self.input_dims, self.units)]
                    + [(self.units, self.units)] * self.hidden_layer
                    + [(self.units, self.output_dims)])
        dec_dims = ([(self.output_dims, self.units)]
                    + [(self.units, self.units)] * self.hidden_layer
                    + [(self.units, self.input_dims)])
        self.n_enc, self.n_dec = len(enc_dims), len(dec_dims)

        keys = jax.random.split(key, self.n_enc + self.n_dec)
        self.encoder_params = [_init_linear(keys[i], fi, fo) for i, (fi, fo) in enumerate(enc_dims)]
        self.decoder_params = [_init_linear(keys[self.n_enc + i], fi, fo)
                               for i, (fi, fo) in enumerate(dec_dims)]

        # ---- lane-padded kernel parameters (zero padding is mathematically inert) -----------
        # Hidden width and embedding width are padded to 128 lanes; the model-facing feature
        # dims (kernel input / umap / recon widths) stay unpadded so no wrapper pad/slice of
        # activations is ever needed.
        self.units_p = _round_up(self.units, _LANE)
        self.emb_p = _round_up(self.output_dims, _LANE)

        def padded_dims(li, n_layers, first_in, last_out):
            rows = first_in if li == 0 else self.units_p
            cols = last_out if li == n_layers - 1 else self.units_p
            return rows, cols

        weights_p, biases_p = [], []
        for li, (w, b) in enumerate(self.encoder_params):
            rows, cols = padded_dims(li, self.n_enc, self.input_dims, self.emb_p)
            weights_p.append(jnp.pad(w, ((0, rows - w.shape[0]), (0, cols - w.shape[1]))))
            biases_p.append(jnp.pad(b, ((0, 0), (0, cols - b.shape[1]))))
        for li, (w, b) in enumerate(self.decoder_params):
            rows, cols = padded_dims(li, self.n_dec, self.emb_p, self.input_dims)
            weights_p.append(jnp.pad(w, ((0, rows - w.shape[0]), (0, cols - w.shape[1]))))
            biases_p.append(jnp.pad(b, ((0, 0), (0, cols - b.shape[1]))))
        self._weights_padded = weights_p

        # All biases stacked into one operand -> one DMA + one VMEM buffer instead of 10.
        w_max = max(int(b.shape[1]) for b in biases_p)
        self._bias_stack = jnp.concatenate(
            [jnp.pad(b, ((0, 0), (0, w_max - b.shape[1]))) for b in biases_p], axis=0)

    # ---- tiling -------------------------------------------------------------

    def _pick_tile_rows(self, n_rows, budget):
        n_rows = int(n_rows)
        if n_rows <= _SUBLANE:
            return max(n_rows, 1)          # block rows == full array dim (allowed)

        weight_buffers = 1 if _single_buffer_supported() else 2
        weight_bytes = 4 * weight_buffers * (
            sum(int(w.size) for w in self._weights_padded) + int(self._bias_stack.size))
        d_in, d_out = self.input_dims, self.output_dims
        w_work = max(self.units_p, self.emb_p, _round_up(d_in, _LANE))

        def act_bytes(t):
            in_b = 2 * 2 * t * d_in * 4                 # 2 row-tile inputs, double-buffered
            out_b = 2 * 2 * t * (d_out + d_in) * 4      # 4 row-tile outputs, double-buffered
            work = 6 * t * w_work * 4                   # live f32 intermediates (both stacks)
            return in_b + out_b + work

        n8 = _round_up(n_rows, _SUBLANE)
        tile = min(1024, n8)                            # cap raised; VMEM check decides below
        if n8 >= 4 * _SUBLANE:
            # Prefer >= 4 grid steps: 2 per v7x TensorCore AND each core still gets i+1
            # prefetch / i-1 writeback overlap.
            tile = min(tile, _round_up(pl.cdiv(n8, 4), _SUBLANE))
        while tile > _SUBLANE and weight_bytes + act_bytes(tile) > budget:
            tile = _round_up(tile // 2, _SUBLANE)
        if tile >= n_rows:
            tile = n_rows                                # single full-extent block
        return int(tile)

    # ---- forward ------------------------------------------------------------

    def __call__(self, edge_to, edge_from):
        edge_to = jnp.asarray(edge_to, jnp.float32)
        edge_from = jnp.asarray(edge_from, jnp.float32)
        n_to, n_from = edge_to.shape[0], edge_from.shape[0]
        n = max(n_to, n_from)
        # edge_to / edge_from normally have identical row counts; only pad if they differ.
        if n_to < n:
            edge_to = jnp.pad(edge_to, ((0, n - n_to), (0, 0)))
        if n_from < n:
            edge_from = jnp.pad(edge_from, ((0, n - n_from), (0, 0)))

        budget = _vmem_budget_bytes()
        tile_rows = self._pick_tile_rows(n, budget)

        umap_to, umap_from, recon_to, recon_from = _fused_forward(
            edge_to, edge_from, self._weights_padded, self._bias_stack,
            self.n_enc, self.n_dec, tile_rows, self.output_dims,
            self.use_bf16, budget)

        if n_to < n:
            umap_to, recon_to = umap_to[:n_to], recon_to[:n_to]
        if n_from < n:
            umap_from, recon_from = umap_from[:n_from], recon_from[:n_from]
        return {"umap": (umap_to, umap_from), "recon": (recon_to, recon_from)}


def _reference_forward(model, edge_to, edge_from):
    """Pure-JAX reference matching the PyTorch forward semantics."""
    def mlp(x, params):
        h = x
        for i, (w, b) in enumerate(params):
            h = h @ w + b
            if i < len(params) - 1:
                h = jnp.maximum(h, 0.0)
        return h

    e_to = mlp(edge_to, model.encoder_params)
    e_from = mlp(edge_from, model.encoder_params)
    r_to = mlp(e_to, model.decoder_params)
    r_from = mlp(e_from, model.decoder_params)
    return {"umap": (e_to, e_from), "recon": (r_to, r_from)}


if __name__ == "__main__":
    # Small shapes consistent with the module: flat feature vectors.
    batch = 8
    input_dims = 32
    output_dims = 2
    units = 32
    hidden_layer = 3

    key = jax.random.PRNGKey(0)
    k_model, k_to, k_from = jax.random.split(key, 3)

    model = SingleVisualizationModelPallas(
        input_dims, output_dims, units, hidden_layer, key=k_model, use_bf16=False
    )

    edge_to = jax.random.normal(k_to, (batch, input_dims), jnp.float32)
    edge_from = jax.random.normal(k_from, (batch, input_dims), jnp.float32)

    outputs = model(edge_to, edge_from)
    jax.block_until_ready(outputs)

    # Numerical check against pure-JAX reference.
    ref = _reference_forward(model, edge_to, edge_from)
    for k in ("umap", "recon"):
        for got, want in zip(outputs[k], ref[k]):
            assert got.shape == want.shape, f"shape mismatch in {k}: {got.shape} vs {want.shape}"
            assert jnp.allclose(got, want, atol=1e-4, rtol=1e-4), f"mismatch in {k}"

    print("KERNEL_OK")
</pallas_src>

<mosaic_0001>
module attributes {stable_mosaic.version = 11 : i64} {
  func.func @_probe_kernel(%arg0: i32, %arg1: memref<8x128xf32, #tpu.memory_space<vmem>>, %arg2: memref<8x128xf32, #tpu.memory_space<vmem>>, %arg3: memref<8x128xf32, #tpu.memory_space<vmem>>) attributes {dimension_semantics = [#tpu.dimension_semantics<parallel>], iteration_bounds = array<i64: 2>, scalar_prefetch = 0 : i64, scratch_operands = 0 : i64, tpu.core_type = #tpu.core_type<tc>, window_params = [{transform_indices = @transform_0, window_bounds = array<i64: 8, 128>}, {pipeline_mode = #tpu.pipeline_mode<synchronous>, transform_indices = @transform_1, window_bounds = array<i64: 8, 128>}, {transform_indices = @transform_2, window_bounds = array<i64: 8, 128>}]} {
    %c0 = arith.constant 0 : index
    %c0_0 = arith.constant 0 : index
    %0 = vector.load %arg1[%c0, %c0_0] : memref<8x128xf32, #tpu.memory_space<vmem>>, vector<8x128xf32>
    %c0_1 = arith.constant 0 : index
    %c0_2 = arith.constant 0 : index
    %1 = vector.load %arg2[%c0_1, %c0_2] : memref<8x128xf32, #tpu.memory_space<vmem>>, vector<8x128xf32>
    %2 = arith.addf %0, %1 : vector<8x128xf32>
    %c0_3 = arith.constant 0 : index
    %c0_4 = arith.constant 0 : index
    %3 = vector.load %arg3[%c0_3, %c0_4] : memref<8x128xf32, #tpu.memory_space<vmem>>, vector<8x128xf32>
    tpu.vector_store %arg3[%c0_3, %c0_4], %2 {strides = array<i32>} : memref<8x128xf32, #tpu.memory_space<vmem>>, vector<8x128xf32>,
    return
  }
  func.func @transform_0(%arg0: i32) -> (i32, i32) {
    %c0_i32 = arith.constant 0 : i32
    %c0_i32_0 = arith.constant 0 : i32
    return %arg0, %c0_i32 : i32, i32
  }
  func.func @transform_1(%arg0: i32) -> (i32, i32) {
    %c0_i32 = arith.constant 0 : i32
    %c0_i32_0 = arith.constant 0 : i32
    %c0_i32_1 = arith.constant 0 : i32
    return %c0_i32, %c0_i32_0 : i32, i32
  }
  func.func @transform_2(%arg0: i32) -> (i32, i32) {
    %c0_i32 = arith.constant 0 : i32
    %c0_i32_0 = arith.constant 0 : i32
    return %arg0, %c0_i32 : i32, i32
  }
}

module attributes {stable_mosaic.version = 11 : i64} {
  func.func @_autoencoder_kernel(%arg0: i32, %arg1: memref<8x32xf32, #tpu.memory_space<vmem>>, %arg2: memref<8x32xf32, #tpu.memory_space<vmem>>, %arg3: memref<32x128xf32, #tpu.memory_space<vmem>>, %arg4: memref<128x128xf32, #tpu.memory_space<vmem>>, %arg5: memref<128x128xf32, #tpu.memory_space<vmem>>, %arg6: memref<128x128xf32, #tpu.memory_space<vmem>>, %arg7: memref<128x128xf32, #tpu.memory_space<vmem>>, %arg8: memref<128x128xf32, #tpu.memory_space<vmem>>, %arg9: memref<128x128xf32, #tpu.memory_space<vmem>>, %arg10: memref<128x128xf32, #tpu.memory_space<vmem>>, %arg11: memref<128x128xf32, #tpu.memory_space<vmem>>, %arg12: memref<128x32xf32, #tpu.memory_space<vmem>>, %arg13: memref<10x128xf32, #tpu.memory_space<vmem>>, %arg14: memref<8x2xf32, #tpu.memory_space<vmem>>, %arg15: memref<8x2xf32, #tpu.memory_space<vmem>>, %arg16: memref<8x32xf32, #tpu.memory_space<vmem>>, %arg17: memref<8x32xf32, #tpu.memory_space<vmem>>) attributes {dimension_semantics = [#tpu.dimension_semantics<parallel>], iteration_bounds = array<i64: 1>, scalar_prefetch = 0 : i64, scratch_operands = 0 : i64, tpu.core_type = #tpu.core_type<tc>, window_params = [{transform_indices = @transform_0, window_bounds = array<i64: 8, 32>}, {transform_indices = @transform_1, window_bounds = array<i64: 8, 32>}, {pipeline_mode = #tpu.pipeline_mode<synchronous>, transform_indices = @transform_2, window_bounds = array<i64: 32, 128>}, {pipeline_mode = #tpu.pipeline_mode<synchronous>, transform_indices = @transform_3, window_bounds = array<i64: 128, 128>}, {pipeline_mode = #tpu.pipeline_mode<synchronous>, transform_indices = @transform_4, window_bounds = array<i64: 128, 128>}, {pipeline_mode = #tpu.pipeline_mode<synchronous>, transform_indices = @transform_5, window_bounds = array<i64: 128, 128>}, {pipeline_mode = #tpu.pipeline_mode<synchronous>, transform_indices = @transform_6, window_bounds = array<i64: 128, 128>}, {pipeline_mode = #tpu.pipeline_mode<synchronous>, transform_indices = @transform_7, window_bounds = array<i64: 128, 128>}, {pipeline_mode = #tpu.pipeline_mode<synchronous>, transform_indices = @transform_8, window_bounds = array<i64: 128, 128>}, {pipeline_mode = #tpu.pipeline_mode<synchronous>, transform_indices = @transform_9, window_bounds = array<i64: 128, 128>}, {pipeline_mode = #tpu.pipeline_mode<synchronous>, transform_indices = @transform_10, window_bounds = array<i64: 128, 128>}, {pipeline_mode = #tpu.pipeline_mode<synchronous>, transform_indices = @transform_11, window_bounds = array<i64: 128, 32>}, {pipeline_mode = #tpu.pipeline_mode<synchronous>, transform_indices = @transform_12, window_bounds = array<i64: 10, 128>}, {transform_indices = @transform_13, window_bounds = array<i64: 8, 2>}, {transform_indices = @transform_14, window_bounds = array<i64: 8, 2>}, {transform_indices = @transform_15, window_bounds = array<i64: 8, 32>}, {transform_indices = @transform_16, window_bounds = array<i64: 8, 32>}]} {
    %c0 = arith.constant 0 : index
    %c0_0 = arith.constant 0 : index
    %0 = vector.load %arg1[%c0, %c0_0] : memref<8x32xf32, #tpu.memory_space<vmem>>, vector<8x32xf32>
    %c0_1 = arith.constant 0 : index
    %c0_2 = arith.constant 0 : index
    %1 = vector.load %arg3[%c0_1, %c0_2] : memref<32x128xf32, #tpu.memory_space<vmem>>, vector<32x128xf32>
    %c0_3 = arith.constant 0 : index
    %c0_4 = arith.constant 0 : index
    %2 = vector.load %arg13[%c0_3, %c0_4] : memref<10x128xf32, #tpu.memory_space<vmem>>, vector<1x128xf32>
    %cst = arith.constant dense<0.000000e+00> : vector<8x128xf32>
    %3 = tpu.matmul %0, %1, %cst {dimension_numbers = #tpu.dot_dimension_numbers<[1], [0], [0], [1], [0, 0, 1, 1], [], []>} : vector<8x32xf32>, vector<32x128xf32>, vector<8x128xf32> -> vector<8x128xf32>
    %4 = vector.broadcast %2 : vector<1x128xf32> to vector<8x128xf32>
    %5 = arith.addf %3, %4 : vector<8x128xf32>
    %cst_5 = arith.constant 0.000000e+00 : f32
    %6 = vector.broadcast %cst_5 : f32 to vector<8x128xf32>
    %7 = arith.maximumf %5, %6 : vector<8x128xf32>
    %c0_6 = arith.constant 0 : index
    %c0_7 = arith.constant 0 : index
    %8 = vector.load %arg4[%c0_6, %c0_7] : memref<128x128xf32, #tpu.memory_space<vmem>>, vector<128x128xf32>
    %c1 = arith.constant 1 : index
    %c0_8 = arith.constant 0 : index
    %9 = vector.load %arg13[%c1, %c0_8] : memref<10x128xf32, #tpu.memory_space<vmem>>, vector<1x128xf32>
    %cst_9 = arith.constant dense<0.000000e+00> : vector<8x128xf32>
    %10 = tpu.matmul %7, %8, %cst_9 {dimension_numbers = #tpu.dot_dimension_numbers<[1], [0], [0], [1], [0, 0, 1, 1], [], []>} : vector<8x128xf32>, vector<128x128xf32>, vector<8x128xf32> -> vector<8x128xf32>
    %11 = vector.broadcast %9 : vector<1x128xf32> to vector<8x128xf32>
    %12 = arith.addf %10, %11 : vector<8x128xf32>
    %cst_10 = arith.constant 0.000000e+00 : f32
    %13 = vector.broadcast %cst_10 : f32 to vector<8x128xf32>
    %14 = arith.maximumf %12, %13 : vector<8x128xf32>
    %c0_11 = arith.constant 0 : index
    %c0_12 = arith.constant 0 : index
    %15 = vector.load %arg5[%c0_11, %c0_12] : memref<128x128xf32, #tpu.memory_space<vmem>>, vector<128x128xf32>
    %c2 = arith.constant 2 : index
    %c0_13 = arith.constant 0 : index
    %16 = vector.load %arg13[%c2, %c0_13] : memref<10x128xf32, #tpu.memory_space<vmem>>, vector<1x128xf32>
    %cst_14 = arith.constant dense<0.000000e+00> : vector<8x128xf32>
    %17 = tpu.matmul %14, %15, %cst_14 {dimension_numbers = #tpu.dot_dimension_numbers<[1], [0], [0], [1], [0, 0, 1, 1], [], []>} : vector<8x128xf32>, vector<128x128xf32>, vector<8x128xf32> -> vector<8x128xf32>
    %18 = vector.broadcast %16 : vector<1x128xf32> to vector<8x128xf32>
    %19 = arith.addf %17, %18 : vector<8x128xf32>
    %cst_15 = arith.constant 0.000000e+00 : f32
    %20 = vector.broadcast %cst_15 : f32 to vector<8x128xf32>
    %21 = arith.maximumf %19, %20 : vector<8x128xf32>
    %c0_16 = arith.constant 0 : index
    %c0_17 = arith.constant 0 : index
    %22 = vector.load %arg6[%c0_16, %c0_17] : memref<128x128xf32, #tpu.memory_space<vmem>>, vector<128x128xf32>
    %c3 = arith.constant 3 : index
    %c0_18 = arith.constant 0 : index
    %23 = vector.load %arg13[%c3, %c0_18] : memref<10x128xf32, #tpu.memory_space<vmem>>, vector<1x128xf32>
    %cst_19 = arith.constant dense<0.000000e+00> : vector<8x128xf32>
    %24 = tpu.matmul %21, %22, %cst_19 {dimension_numbers = #tpu.dot_dimension_numbers<[1], [0], [0], [1], [0, 0, 1, 1], [], []>} : vector<8x128xf32>, vector<128x128xf32>, vector<8x128xf32> -> vector<8x128xf32>
    %25 = vector.broadcast %23 : vector<1x128xf32> to vector<8x128xf32>
    %26 = arith.addf %24, %25 : vector<8x128xf32>
    %cst_20 = arith.constant 0.000000e+00 : f32
    %27 = vector.broadcast %cst_20 : f32 to vector<8x128xf32>
    %28 = arith.maximumf %26, %27 : vector<8x128xf32>
    %c0_21 = arith.constant 0 : index
    %c0_22 = arith.constant 0 : index
    %29 = vector.load %arg7[%c0_21, %c0_22] : memref<128x128xf32, #tpu.memory_space<vmem>>, vector<128x128xf32>
    %c4 = arith.constant 4 : index
    %c0_23 = arith.constant 0 : index
    %30 = vector.load %arg13[%c4, %c0_23] : memref<10x128xf32, #tpu.memory_space<vmem>>, vector<1x128xf32>
    %cst_24 = arith.constant dense<0.000000e+00> : vector<8x128xf32>
    %31 = tpu.matmul %28, %29, %cst_24 {dimension_numbers = #tpu.dot_dimension_numbers<[1], [0], [0], [1], [0, 0, 1, 1], [], []>} : vector<8x128xf32>, vector<128x128xf32>, vector<8x128xf32> -> vector<8x128xf32>
    %32 = vector.broadcast %30 : vector<1x128xf32> to vector<8x128xf32>
    %33 = arith.addf %31, %32 : vector<8x128xf32>
    %34 = vector.extract_strided_slice %33 {offsets = [0, 0], sizes = [8, 2], strides = [1, 1]} : vector<8x128xf32> to vector<8x2xf32>
    %c0_25 = arith.constant 0 : index
    %c0_26 = arith.constant 0 : index
    %35 = vector.load %arg14[%c0_25, %c0_26] : memref<8x2xf32, #tpu.memory_space<vmem>>, vector<8x2xf32>
    tpu.vector_store %arg14[%c0_25, %c0_26], %34 {strides = array<i32>} : memref<8x2xf32, #tpu.memory_space<vmem>>, vector<8x2xf32>,
    %c0_27 = arith.constant 0 : index
    %c0_28 = arith.constant 0 : index
    %36 = vector.load %arg8[%c0_27, %c0_28] : memref<128x128xf32, #tpu.memory_space<vmem>>, vector<128x128xf32>
    %c5 = arith.constant 5 : index
    %c0_29 = arith.constant 0 : index
    %37 = vector.load %arg13[%c5, %c0_29] : memref<10x128xf32, #tpu.memory_space<vmem>>, vector<1x128xf32>
    %cst_30 = arith.constant dense<0.000000e+00> : vector<8x128xf32>
    %38 = tpu.matmul %33, %36, %cst_30 {dimension_numbers = #tpu.dot_dimension_numbers<[1], [0], [0], [1], [0, 0, 1, 1], [], []>} : vector<8x128xf32>, vector<128x128xf32>, vector<8x128xf32> -> vector<8x128xf32>
    %39 = vector.broadcast %37 : vector<1x128xf32> to vector<8x128xf32>
    %40 = arith.addf %38, %39 : vector<8x128xf32>
    %cst_31 = arith.constant 0.000000e+00 : f32
    %41 = vector.broadcast %cst_31 : f32 to vector<8x128xf32>
    %42 = arith.maximumf %40, %41 : vector<8x128xf32>
    %c0_32 = arith.constant 0 : index
    %c0_33 = arith.constant 0 : index
    %43 = vector.load %arg9[%c0_32, %c0_33] : memref<128x128xf32, #tpu.memory_space<vmem>>, vector<128x128xf32>
    %c6 = arith.constant 6 : index
    %c0_34 = arith.constant 0 : index
    %44 = vector.load %arg13[%c6, %c0_34] : memref<10x128xf32, #tpu.memory_space<vmem>>, vector<1x128xf32>
    %cst_35 = arith.constant dense<0.000000e+00> : vector<8x128xf32>
    %45 = tpu.matmul %42, %43, %cst_35 {dimension_numbers = #tpu.dot_dimension_numbers<[1], [0], [0], [1], [0, 0, 1, 1], [], []>} : vector<8x128xf32>, vector<128x128xf32>, vector<8x128xf32> -> vector<8x128xf32>
    %46 = vector.broadcast %44 : vector<1x128xf32> to vector<8x128xf32>
    %47 = arith.addf %45, %46 : vector<8x128xf32>
    %cst_36 = arith.constant 0.000000e+00 : f32
    %48 = vector.broadcast %cst_36 : f32 to vector<8x128xf32>
    %49 = arith.maximumf %47, %48 : vector<8x128xf32>
    %c0_37 = arith.constant 0 : index
    %c0_38 = arith.constant 0 : index
    %50 = vector.load %arg10[%c0_37, %c0_38] : memref<128x128xf32, #tpu.memory_space<vmem>>, vector<128x128xf32>
    %c7 = arith.constant 7 : index
    %c0_39 = arith.constant 0 : index
    %51 = vector.load %arg13[%c7, %c0_39] : memref<10x128xf32, #tpu.memory_space<vmem>>, vector<1x128xf32>
    %cst_40 = arith.constant dense<0.000000e+00> : vector<8x128xf32>
    %52 = tpu.matmul %49, %50, %cst_40 {dimension_numbers = #tpu.dot_dimension_numbers<[1], [0], [0], [1], [0, 0, 1, 1], [], []>} : vector<8x128xf32>, vector<128x128xf32>, vector<8x128xf32> -> vector<8x128xf32>
    %53 = vector.broadcast %51 : vector<1x128xf32> to vector<8x128xf32>
    %54 = arith.addf %52, %53 : vector<8x128xf32>
    %cst_41 = arith.constant 0.000000e+00 : f32
    %55 = vector.broadcast %cst_41 : f32 to vector<8x128xf32>
    %56 = arith.maximumf %54, %55 : vector<8x128xf32>
    %c0_42 = arith.constant 0 : index
    %c0_43 = arith.constant 0 : index
    %57 = vector.load %arg11[%c0_42, %c0_43] : memref<128x128xf32, #tpu.memory_space<vmem>>, vector<128x128xf32>
    %c8 = arith.constant 8 : index
    %c0_44 = arith.constant 0 : index
    %58 = vector.load %arg13[%c8, %c0_44] : memref<10x128xf32, #tpu.memory_space<vmem>>, vector<1x128xf32>
    %cst_45 = arith.constant dense<0.000000e+00> : vector<8x128xf32>
    %59 = tpu.matmul %56, %57, %cst_45 {dimension_numbers = #tpu.dot_dimension_numbers<[1], [0], [0], [1], [0, 0, 1, 1], [], []>} : vector<8x128xf32>, vector<128x128xf32>, vector<8x128xf32> -> vector<8x128xf32>
    %60 = vector.broadcast %58 : vector<1x128xf32> to vector<8x128xf32>
    %61 = arith.addf %59, %60 : vector<8x128xf32>
    %cst_46 = arith.constant 0.000000e+00 : f32
    %62 = vector.broadcast %cst_46 : f32 to vector<8x128xf32>
    %63 = arith.maximumf %61, %62 : vector<8x128xf32>
    %c0_47 = arith.constant 0 : index
    %c0_48 = arith.constant 0 : index
    %64 = vector.load %arg12[%c0_47, %c0_48] : memref<128x32xf32, #tpu.memory_space<vmem>>, vector<128x32xf32>
    %c9 = arith.constant 9 : index
    %c0_49 = arith.constant 0 : index
    %65 = vector.load %arg13[%c9, %c0_49] : memref<10x128xf32, #tpu.memory_space<vmem>>, vector<1x32xf32>
    %cst_50 = arith.constant dense<0.000000e+00> : vector<8x32xf32>
    %66 = tpu.matmul %63, %64, %cst_50 {dimension_numbers = #tpu.dot_dimension_numbers<[1], [0], [0], [1], [0, 0, 1, 1], [], []>} : vector<8x128xf32>, vector<128x32xf32>, vector<8x32xf32> -> vector<8x32xf32>
    %67 = vector.broadcast %65 : vector<1x32xf32> to vector<8x32xf32>
    %68 = arith.addf %66, %67 : vector<8x32xf32>
    %c0_51 = arith.constant 0 : index
    %c0_52 = arith.constant 0 : index
    %69 = vector.load %arg16[%c0_51, %c0_52] : memref<8x32xf32, #tpu.memory_space<vmem>>, vector<8x32xf32>
    tpu.vector_store %arg16[%c0_51, %c0_52], %68 {strides = array<i32>} : memref<8x32xf32, #tpu.memory_space<vmem>>, vector<8x32xf32>,
    %c0_53 = arith.constant 0 : index
    %c0_54 = arith.constant 0 : index
    %70 = vector.load %arg2[%c0_53, %c0_54] : memref<8x32xf32, #tpu.memory_space<vmem>>, vector<8x32xf32>
    %c0_55 = arith.constant 0 : index
    %c0_56 = arith.constant 0 : index
    %71 = vector.load %arg3[%c0_55, %c0_56] : memref<32x128xf32, #tpu.memory_space<vmem>>, vector<32x128xf32>
    %c0_57 = arith.constant 0 : index
    %c0_58 = arith.constant 0 : index
    %72 = vector.load %arg13[%c0_57, %c0_58] : memref<10x128xf32, #tpu.memory_space<vmem>>, vector<1x128xf32>
    %cst_59 = arith.constant dense<0.000000e+00> : vector<8x128xf32>
    %73 = tpu.matmul %70, %71, %cst_59 {dimension_numbers = #tpu.dot_dimension_numbers<[1], [0], [0], [1], [0, 0, 1, 1], [], []>} : vector<8x32xf32>, vector<32x128xf32>, vector<8x128xf32> -> vector<8x128xf32>
    %74 = vector.broadcast %72 : vector<1x128xf32> to vector<8x128xf32>
    %75 = arith.addf %73, %74 : vector<8x128xf32>
    %cst_60 = arith.constant 0.000000e+00 : f32
    %76 = vector.broadcast %cst_60 : f32 to vector<8x128xf32>
    %77 = arith.maximumf %75, %76 : vector<8x128xf32>
    %c0_61 = arith.constant 0 : index
    %c0_62 = arith.constant 0 : index
    %78 = vector.load %arg4[%c0_61, %c0_62] : memref<128x128xf32, #tpu.memory_space<vmem>>, vector<128x128xf32>
    %c1_63 = arith.constant 1 : index
    %c0_64 = arith.constant 0 : index
    %79 = vector.load %arg13[%c1_63, %c0_64] : memref<10x128xf32, #tpu.memory_space<vmem>>, vector<1x128xf32>
    %cst_65 = arith.constant dense<0.000000e+00> : vector<8x128xf32>
    %80 = tpu.matmul %77, %78, %cst_65 {dimension_numbers = #tpu.dot_dimension_numbers<[1], [0], [0], [1], [0, 0, 1, 1], [], []>} : vector<8x128xf32>, vector<128x128xf32>, vector<8x128xf32> -> vector<8x128xf32>
    %81 = vector.broadcast %79 : vector<1x128xf32> to vector<8x128xf32>
    %82 = arith.addf %80, %81 : vector<8x128xf32>
    %cst_66 = arith.constant 0.000000e+00 : f32
    %83 = vector.broadcast %cst_66 : f32 to vector<8x128xf32>
    %84 = arith.maximumf %82, %83 : vector<8x128xf32>
    %c0_67 = arith.constant 0 : index
    %c0_68 = arith.constant 0 : index
    %85 = vector.load %arg5[%c0_67, %c0_68] : memref<128x128xf32, #tpu.memory_space<vmem>>, vector<128x128xf32>
    %c2_69 = arith.constant 2 : index
    %c0_70 = arith.constant 0 : index
    %86 = vector.load %arg13[%c2_69, %c0_70] : memref<10x128xf32, #tpu.memory_space<vmem>>, vector<1x128xf32>
    %cst_71 = arith.constant dense<0.000000e+00> : vector<8x128xf32>
    %87 = tpu.matmul %84, %85, %cst_71 {dimension_numbers = #tpu.dot_dimension_numbers<[1], [0], [0], [1], [0, 0, 1, 1], [], []>} : vector<8x128xf32>, vector<128x128xf32>, vector<8x128xf32> -> vector<8x128xf32>
    %88 = vector.broadcast %86 : vector<1x128xf32> to vector<8x128xf32>
    %89 = arith.addf %87, %88 : vector<8x128xf32>
    %cst_72 = arith.constant 0.000000e+00 : f32
    %90 = vector.broadcast %cst_72 : f32 to vector<8x128xf32>
    %91 = arith.maximumf %89, %90 : vector<8x128xf32>
    %c0_73 = arith.constant 0 : index
    %c0_74 = arith.constant 0 : index
    %92 = vector.load %arg6[%c0_73, %c0_74] : memref<128x128xf32, #tpu.memory_space<vmem>>, vector<128x128xf32>
    %c3_75 = arith.constant 3 : index
    %c0_76 = arith.constant 0 : index
    %93 = vector.load %arg13[%c3_75, %c0_76] : memref<10x128xf32, #tpu.memory_space<vmem>>, vector<1x128xf32>
    %cst_77 = arith.constant dense<0.000000e+00> : vector<8x128xf32>
    %94 = tpu.matmul %91, %92, %cst_77 {dimension_numbers = #tpu.dot_dimension_numbers<[1], [0], [0], [1], [0, 0, 1, 1], [], []>} : vector<8x128xf32>, vector<128x128xf32>, vector<8x128xf32> -> vector<8x128xf32>
    %95 = vector.broadcast %93 : vector<1x128xf32> to vector<8x128xf32>
    %96 = arith.addf %94, %95 : vector<8x128xf32>
    %cst_78 = arith.constant 0.000000e+00 : f32
    %97 = vector.broadcast %cst_78 : f32 to vector<8x128xf32>
    %98 = arith.maximumf %96, %97 : vector<8x128xf32>
    %c0_79 = arith.constant 0 : index
    %c0_80 = arith.constant 0 : index
    %99 = vector.load %arg7[%c0_79, %c0_80] : memref<128x128xf32, #tpu.memory_space<vmem>>, vector<128x128xf32>
    %c4_81 = arith.constant 4 : index
    %c0_82 = arith.constant 0 : index
    %100 = vector.load %arg13[%c4_81, %c0_82] : memref<10x128xf32, #tpu.memory_space<vmem>>, vector<1x128xf32>
    %cst_83 = arith.constant dense<0.000000e+00> : vector<8x128xf32>
    %101 = tpu.matmul %98, %99, %cst_83 {dimension_numbers = #tpu.dot_dimension_numbers<[1], [0], [0], [1], [0, 0, 1, 1], [], []>} : vector<8x128xf32>, vector<128x128xf32>, vector<8x128xf32> -> vector<8x128xf32>
    %102 = vector.broadcast %100 : vector<1x128xf32> to vector<8x128xf32>
    %103 = arith.addf %101, %102 : vector<8x128xf32>
    %104 = vector.extract_strided_slice %103 {offsets = [0, 0], sizes = [8, 2], strides = [1, 1]} : vector<8x128xf32> to vector<8x2xf32>
    %c0_84 = arith.constant 0 : index
    %c0_85 = arith.constant 0 : index
    %105 = vector.load %arg15[%c0_84, %c0_85] : memref<8x2xf32, #tpu.memory_space<vmem>>, vector<8x2xf32>
    tpu.vector_store %arg15[%c0_84, %c0_85], %104 {strides = array<i32>} : memref<8x2xf32, #tpu.memory_space<vmem>>, vector<8x2xf32>,
    %c0_86 = arith.constant 0 : index
    %c0_87 = arith.constant 0 : index
    %106 = vector.load %arg8[%c0_86, %c0_87] : memref<128x128xf32, #tpu.memory_space<vmem>>, vector<128x128xf32>
    %c5_88 = arith.constant 5 : index
    %c0_89 = arith.constant 0 : index
    %107 = vector.load %arg13[%c5_88, %c0_89] : memref<10x128xf32, #tpu.memory_space<vmem>>, vector<1x128xf32>
    %cst_90 = arith.constant dense<0.000000e+00> : vector<8x128xf32>
    %108 = tpu.matmul %103, %106, %cst_90 {dimension_numbers = #tpu.dot_dimension_numbers<[1], [0], [0], [1], [0, 0, 1, 1], [], []>} : vector<8x128xf32>, vector<128x128xf32>, vector<8x128xf32> -> vector<8x128xf32>
    %109 = vector.broadcast %107 : vector<1x128xf32> to vector<8x128xf32>
    %110 = arith.addf %108, %109 : vector<8x128xf32>
    %cst_91 = arith.constant 0.000000e+00 : f32
    %111 = vector.broadcast %cst_91 : f32 to vector<8x128xf32>
    %112 = arith.maximumf %110, %111 : vector<8x128xf32>
    %c0_92 = arith.constant 0 : index
    %c0_93 = arith.constant 0 : index
    %113 = vector.load %arg9[%c0_92, %c0_93] : memref<128x128xf32, #tpu.memory_space<vmem>>, vector<128x128xf32>
    %c6_94 = arith.constant 6 : index
    %c0_95 = arith.constant 0 : index
    %114 = vector.load %arg13[%c6_94, %c0_95] : memref<10x128xf32, #tpu.memory_space<vmem>>, vector<1x128xf32>
    %cst_96 = arith.constant dense<0.000000e+00> : vector<8x128xf32>
    %115 = tpu.matmul %112, %113, %cst_96 {dimension_numbers = #tpu.dot_dimension_numbers<[1], [0], [0], [1], [0, 0, 1, 1], [], []>} : vector<8x128xf32>, vector<128x128xf32>, vector<8x128xf32> -> vector<8x128xf32>
    %116 = vector.broadcast %114 : vector<1x128xf32> to vector<8x128xf32>
    %117 = arith.addf %115, %116 : vector<8x128xf32>
    %cst_97 = arith.constant 0.000000e+00 : f32
    %118 = vector.broadcast %cst_97 : f32 to vector<8x128xf32>
    %119 = arith.maximumf %117, %118 : vector<8x128xf32>
    %c0_98 = arith.constant 0 : index
    %c0_99 = arith.constant 0 : index
    %120 = vector.load %arg10[%c0_98, %c0_99] : memref<128x128xf32, #tpu.memory_space<vmem>>, vector<128x128xf32>
    %c7_100 = arith.constant 7 : index
    %c0_101 = arith.constant 0 : index
    %121 = vector.load %arg13[%c7_100, %c0_101] : memref<10x128xf32, #tpu.memory_space<vmem>>, vector<1x128xf32>
    %cst_102 = arith.constant dense<0.000000e+00> : vector<8x128xf32>
    %122 = tpu.matmul %119, %120, %cst_102 {dimension_numbers = #tpu.dot_dimension_numbers<[1], [0], [0], [1], [0, 0, 1, 1], [], []>} : vector<8x128xf32>, vector<128x128xf32>, vector<8x128xf32> -> vector<8x128xf32>
    %123 = vector.broadcast %121 : vector<1x128xf32> to vector<8x128xf32>
    %124 = arith.addf %122, %123 : vector<8x128xf32>
    %cst_103 = arith.constant 0.000000e+00 : f32
    %125 = vector.broadcast %cst_103 : f32 to vector<8x128xf32>
    %126 = arith.maximumf %124, %125 : vector<8x128xf32>
    %c0_104 = arith.constant 0 : index
    %c0_105 = arith.constant 0 : index
    %127 = vector.load %arg11[%c0_104, %c0_105] : memref<128x128xf32, #tpu.memory_space<vmem>>, vector<128x128xf32>
    %c8_106 = arith.constant 8 : index
    %c0_107 = arith.constant 0 : index
    %128 = vector.load %arg13[%c8_106, %c0_107] : memref<10x128xf32, #tpu.memory_space<vmem>>, vector<1x128xf32>
    %cst_108 = arith.constant dense<0.000000e+00> : vector<8x128xf32>
    %129 = tpu.matmul %126, %127, %cst_108 {dimension_numbers = #tpu.dot_dimension_numbers<[1], [0], [0], [1], [0, 0, 1, 1], [], []>} : vector<8x128xf32>, vector<128x128xf32>, vector<8x128xf32> -> vector<8x128xf32>
    %130 = vector.broadcast %128 : vector<1x128xf32> to vector<8x128xf32>
    %131 = arith.addf %129, %130 : vector<8x128xf32>
    %cst_109 = arith.constant 0.000000e+00 : f32
    %132 = vector.broadcast %cst_109 : f32 to vector<8x128xf32>
    %133 = arith.maximumf %131, %132 : vector<8x128xf32>
    %c0_110 = arith.constant 0 : index
    %c0_111 = arith.constant 0 : index
    %134 = vector.load %arg12[%c0_110, %c0_111] : memref<128x32xf32, #tpu.memory_space<vmem>>, vector<128x32xf32>
    %c9_112 = arith.constant 9 : index
    %c0_113 = arith.constant 0 : index
    %135 = vector.load %arg13[%c9_112, %c0_113] : memref<10x128xf32, #tpu.memory_space<vmem>>, vector<1x32xf32>
    %cst_114 = arith.constant dense<0.000000e+00> : vector<8x32xf32>
    %136 = tpu.matmul %133, %134, %cst_114 {dimension_numbers = #tpu.dot_dimension_numbers<[1], [0], [0], [1], [0, 0, 1, 1], [], []>} : vector<8x128xf32>, vector<128x32xf32>, vector<8x32xf32> -> vector<8x32xf32>
    %137 = vector.broadcast %135 : vector<1x32xf32> to vector<8x32xf32>
    %138 = arith.addf %136, %137 : vector<8x32xf32>
    %c0_115 = arith.constant 0 : index
    %c0_116 = arith.constant 0 : index
    %139 = vector.load %arg17[%c0_115, %c0_116] : memref<8x32xf32, #tpu.memory_space<vmem>>, vector<8x32xf32>
    tpu.vector_store %arg17[%c0_115, %c0_116], %138 {strides = array<i32>} : memref<8x32xf32, #tpu.memory_space<vmem>>, vector<8x32xf32>,
    return
  }
  func.func @transform_0(%arg0: i32) -> (i32, i32) {
    %c0_i32 = arith.constant 0 : i32
    %c0_i32_0 = arith.constant 0 : i32
    return %arg0, %c0_i32 : i32, i32
  }
  func.func @transform_1(%arg0: i32) -> (i32, i32) {
    %c0_i32 = arith.constant 0 : i32
    %c0_i32_0 = arith.constant 0 : i32
    return %arg0, %c0_i32 : i32, i32
  }
  func.func @transform_2(%arg0: i32) -> (i32, i32) {
    %c0_i32 = arith.constant 0 : i32
    %c0_i32_0 = arith.constant 0 : i32
    %c0_i32_1 = arith.constant 0 : i32
    return %c0_i32, %c0_i32_0 : i32, i32
  }
  func.func @transform_3(%arg0: i32) -> (i32, i32) {
    %c0_i32 = arith.constant 0 : i32
    %c0_i32_0 = arith.constant 0 : i32
    %c0_i32_1 = arith.constant 0 : i32
    return %c0_i32, %c0_i32_0 : i32, i32
  }
  func.func @transform_4(%arg0: i32) -> (i32, i32) {
    %c0_i32 = arith.constant 0 : i32
    %c0_i32_0 = arith.constant 0 : i32
    %c0_i32_1 = arith.constant 0 : i32
    return %c0_i32, %c0_i32_0 : i32, i32
  }
  func.func @transform_5(%arg0: i32) -> (i32, i32) {
    %c0_i32 = arith.constant 0 : i32
    %c0_i32_0 = arith.constant 0 : i32
    %c0_i32_1 = arith.constant 0 : i32
    return %c0_i32, %c0_i32_0 : i32, i32
  }
  func.func @transform_6(%arg0: i32) -> (i32, i32) {
    %c0_i32 = arith.constant 0 : i32
    %c0_i32_0 = arith.constant 0 : i32
    %c0_i32_1 = arith.constant 0 : i32
    return %c0_i32, %c0_i32_0 : i32, i32
  }
  func.func @transform_7(%arg0: i32) -> (i32, i32) {
    %c0_i32 = arith.constant 0 : i32
    %c0_i32_0 = arith.constant 0 : i32
    %c0_i32_1 = arith.constant 0 : i32
    return %c0_i32, %c0_i32_0 : i32, i32
  }
  func.func @transform_8(%arg0: i32) -> (i32, i32) {
    %c0_i32 = arith.constant 0 : i32
    %c0_i32_0 = arith.constant 0 : i32
    %c0_i32_1 = arith.constant 0 : i32
    return %c0_i32, %c0_i32_0 : i32, i32
  }
  func.func @transform_9(%arg0: i32) -> (i32, i32) {
    %c0_i32 = arith.constant 0 : i32
    %c0_i32_0 = arith.constant 0 : i32
    %c0_i32_1 = arith.constant 0 : i32
    return %c0_i32, %c0_i32_0 : i32, i32
  }
  func.func @transform_10(%arg0: i32) -> (i32, i32) {
    %c0_i32 = arith.constant 0 : i32
    %c0_i32_0 = arith.constant 0 : i32
    %c0_i32_1 = arith.constant 0 : i32
    return %c0_i32, %c0_i32_0 : i32, i32
  }
  func.func @transform_11(%arg0: i32) -> (i32, i32) {
    %c0_i32 = arith.constant 0 : i32
    %c0_i32_0 = arith.constant 0 : i32
    %c0_i32_1 = arith.constant 0 : i32
    return %c0_i32, %c0_i32_0 : i32, i32
  }
  func.func @transform_12(%arg0: i32) -> (i32, i32) {
    %c0_i32 = arith.constant 0 : i32
    %c0_i32_0 = arith.constant 0 : i32
    %c0_i32_1 = arith.constant 0 : i32
    return %c0_i32, %c0_i32_0 : i32, i32
  }
  func.func @transform_13(%arg0: i32) -> (i32, i32) {
    %c0_i32 = arith.constant 0 : i32
    %c0_i32_0 = arith.constant 0 : i32
    return %arg0, %c0_i32 : i32, i32
  }
  func.func @transform_14(%arg0: i32) -> (i32, i32) {
    %c0_i32 = arith.constant 0 : i32
    %c0_i32_0 = arith.constant 0 : i32
    return %arg0, %c0_i32 : i32, i32
  }
  func.func @transform_15(%arg0: i32) -> (i32, i32) {
    %c0_i32 = arith.constant 0 : i32
    %c0_i32_0 = arith.constant 0 : i32
    return %arg0, %c0_i32 : i32, i32
  }
  func.func @transform_16(%arg0: i32) -> (i32, i32) {
    %c0_i32 = arith.constant 0 : i32
    %c0_i32_0 = arith.constant 0 : i32
    return %arg0, %c0_i32 : i32, i32
  }
}

</mosaic_0001>

<bundles_post_ra>
// kernel: tpu_custom_call.1
= control target key start
LH: loop header
LB: loop body
LE: loop exit
PB: predicated region body
PF: predicated region fallthrough
CT: control target
= control target key end

     0   :  { %7 = vsyncpa [#allocation3], 0  ;;  %s649_s0 = inlined_call_operand.hbm [shape: f32[16,128], index: 0, kind: input, shape index: {}]   ;;  %s650_s1 = inlined_call_operand.hbm [shape: f32[8,128], index: 1, kind: input, shape index: {}]   ;;  %s651_s2 = inlined_call_operand.hbm [shape: f32[16,128], index: 2, kind: output, shape index: {}]  }
   0x1   :  { %9 = vsyncpa [#allocation3 + $0x1], 0 }
   0x2   :  { %10 = vsyncpa [#allocation6], 0 }
   0x3   :  { %11 = vsyncpa [#allocation4], 0 }
   0x4   :  { %13 = vsyncpa [#allocation4 + $0x1], 0  ;;  %s483_s9 = smov 0   ;;  %s485_s10 = smov 0  }
   0x5   :  { %s487_s11 = smov 0   ;;  %s489_s12 = smov 0  }
   0x6 LB: > { %s504_s13 = sadd.s32 4294967295, %s463_s12   ;;  %s270_s14 = sadd.s32 4294967294, %s463_s12   ;;  %s463_s12 = sphi %s489_s12, %s674_s12   ;;  %s459_s11 = sphi %s487_s11, %s673_s11   ;;  %s455_s10 = sphi %s485_s10, %s672_s10   ;;  %s451_s9 = sphi %s483_s9, %s671_s9  }
   0x7   : > { %p39_p0 = scmp.ne.s32.totalorder %s455_s10, %s451_s9  ;;  %p652_p1 = scmp.eq.s32.totalorder %s504_s13, 0 }
   0x8   : > { %p90_p3 = scmp.eq.s32.totalorder %s270_s14, 1  ;;  %p271_p5 = scmp.ge.s32.totalorder %s463_s12, 1 }
   0x9   : > { %p513_p4 = por %p652_p1, %p39_p0  ;;  %p97_p7 = scmp.lt.s32.totalorder %s463_s12, 3 }
   0xa   : > { %p518_p6 = por %p90_p3, %p39_p0  ;;  %s465_s18 = smov [#allocation5]  }
   0xb   : > { %s656_s15 = scalar_select %p513_p4, 1, 0 }
   0xc   : > { %s657_s16 = scalar_select %p518_p6, 1, 0 }
   0xd   : > { %p523_p8 = pnand %p271_p5, %p97_p7  ;;  %s110_s19 = sshll.u32 %s465_s18, 4  ;;  %s111_s19 = int_to_ptr.vmem [resolvable:$true] %s110_s19 }
   0xe   : > { %s531_s20 = sadd.s32 1, %s463_s12   ;;  %s26_s24 = sadd.s32 1, %s459_s11 }
   0xf   : > { %s658_s17 = scalar_select %p523_p8, 1, 0 }
  0x10   : > { %p292_p10 = pneg %p523_p8  ;;  %s23_s22 = ssub.s32 %s463_s12, %s531_s20 }
  0x11   : > { %p541_p12 = scmp.eq.s32.totalorder %s23_s22, 0  ;;  %p33_p13 = scmp.ne.s32.totalorder %s459_s11, %s455_s10 }
  0x12   : > { %p535_p11 = pnand %p292_p10, %p652_p1  ;;  %s352_s25 = scalar_lea.vmem %s111_s19, 128 }
  0x13   : > { %p353_p3 = scmp.ne.s32.totalorder %s111_s19, %s352_s25  ;;  %p360_p9 = scmp.lt.s32.totalorder %s111_s19, %s111_s19 }
  0x14   : > { %p343_p0 = pneg %p535_p11  ;;  %p361_p2 = scmp.lt.s32.totalorder %s352_s25, %s352_s25 }
  0x16   : > { %p355_p5 = pnand %p353_p3, %p343_p0  ;;  %p362_p10 = por %p361_p2, %p360_p9 }
  0x18   : > { %p356_p7 = pneg %p355_p5 }
  0x1a   : > { %p363_p1 = pnand %p362_p10, %p356_p7 }
  0x1c   : > { %366 = shalt.err (!%p363_p1)
}
  0x1d   : > { %295 = dma.hbm_to_vmem [thread:$0]  (!%p535_p11), %s650_s1, 128, %s111_s19, [#allocation6]  }
  0x1e   : > { %s558_s28 = scalar_select %p541_p12, %s459_s11, %s26_s24  }
  0x1f   : > { %p34_p1 = scmp.eq.s32.totalorder %s463_s12, 0  ;;  %p661_p2 = scmp.eq.s32.totalorder %s504_s13, 1 }
  0x20   : > { %p305_p0 = scmp.lt.s32.totalorder %s463_s12, 2  ;;  %s121_s30 = sand.u32 1, %s459_s11  }
  0x21   : > { %p566_p9 = por %p661_p2, %p33_p13  ;;  %p35_p3 = por %p34_p1, %p33_p13 }
  0x22   : > { %s274_s3 = sshll.u32 %s121_s30, 3  ;;  %s275_s4 = sshll.u32 %s463_s12, 7 }
  0x23   : > { %s662_s29 = scalar_select %p566_p9, 1, 0 }
  0x24   : > { %s579_s7 = scalar_lea.hbm %s649_s0, %s275_s4  ;;  %s125_s8 = scalar_lea.vmem [#allocation2], %s274_s3 }
  0x25   : > { %s132_s14 = sshll.u32 %s125_s8, 4  ;;  %p581_p11 = pnand %p305_p0, %p35_p3  ;;  %s133_s14 = int_to_ptr.vmem [resolvable:$true] %s132_s14 }
  0x26   : > { %s122_s19 = scalar_lea.sflag [#allocation3], %s121_s30  ;;  %s367_s21 = scalar_lea.hbm %s579_s7, 128 }
  0x27   : > { %p368_p12 = scmp.ne.s32.totalorder %s579_s7, %s367_s21  ;;  %p369_p13 = pneg %p581_p11 }
  0x28   : > { %s372_s24 = scalar_lea.hbm %s649_s0, 256  ;;  %p373_p10 = scmp.lt.s32.totalorder %s579_s7, %s649_s0 }
  0x29   : > { %p370_p5 = pnand %p369_p13, %p368_p12  ;;  %p374_p1 = scmp.lt.s32.totalorder %s372_s24, %s367_s21 }
  0x2b   : > { %p371_p7 = pneg %p370_p5  ;;  %p375_p2 = por %p374_p1, %p373_p10 }
  0x2d   : > { %p376_p0 = pnand %p375_p2, %p371_p7 }
  0x2f   : > { %379 = shalt.err (!%p376_p0)
}
  0x30   : > { %s380_s27 = scalar_lea.vmem %s133_s14, 128  ;;  %s466_s30 = smov [#allocation2]  }
  0x31   : > { %p381_p3 = scmp.ne.s32.totalorder %s133_s14, %s380_s27  ;;  %s385_s3 = sshll.u32 %s466_s30, 4  ;;  %s386_s3 = int_to_ptr.vmem [resolvable:$false] %s385_s3 }
  0x32   : > { %s387_s4 = scalar_lea.vmem %s386_s3, 256  ;;  %p388_p12 = scmp.lt.s32.totalorder %s133_s14, %s386_s3 }
  0x33   : > { %p383_p6 = pnand %p381_p3, %p369_p13  ;;  %p389_p5 = scmp.lt.s32.totalorder %s387_s4, %s380_s27 }
  0x35   : > { %p384_p9 = pneg %p383_p6  ;;  %p390_p4 = por %p389_p5, %p388_p12 }
  0x37   : > { %p391_p8 = pnand %p390_p4, %p384_p9 }
  0x39   : > { %394 = shalt.err (!%p391_p8)
}
  0x3a   : > { %299 = dma.hbm_to_vmem [thread:$0]  (!%p581_p11), %s579_s7, 128, %s133_s14, %s122_s19  }
  0x3b   : > { %p664_p7 = scmp.ne.s32.totalorder %s658_s17, 0 }
  0x3c   : > { %s602_s5 = sand.u32 (!%p664_p7), 1, %s455_s10   ;;  %p665_p6 = scmp.ne.s32.totalorder (!%p664_p7), %s656_s15, 0 }
  0x3d   : > { %141 = sbr.rel (%p664_p7) target bundleno = 95 (0x5f), region = 28  ;;  %s277_s6 = sshll.u32 (!%p664_p7), %s602_s5, 3 }
  0x3e   : > { %s144_s8 = scalar_lea.sflag (!%p664_p7), [#allocation3], %s602_s5  ;;  %s147_s21 = scalar_lea.vmem (!%p664_p7), [#allocation2], %s277_s6 }
  0x42   : > { %438 = dma.done.wait (%p665_p6), %s144_s8, 128  }
  0x43   : > { %440 = vsyncadd (%p665_p6), %s144_s8, 4294967168  ;;  %p666_p4 = scmp.eq.s32.totalorder %s504_s13, 0 }
  0x45   : > { %442 = dma.done.wait (%p666_p4), [#allocation6], 128   ;;  %p667_p8 = pmov %p666_p4 }
  0x46   : > { %s171_s17 = scalar_lea.vmem [#allocation7], %s277_s6  ;;  %s281_s14 = sshll.u32 %s504_s13, 7  ;;  %v172_v0 = vld [vmem:[%s147_s21] sm:$0xff]  ;;  %v173_v1 = vld [vmem:[#allocation5] sm:$0xff] }
  0x47   : > { %444 = vsyncadd (%p667_p8), [#allocation6], 4294967168  ;;  %s190_s7 = sshll.u32 %s171_s17, 4  ;;  %v174_v2 = vadd.f32 %v173_v1, %v172_v0  ;;  %s188_s15 = scalar_lea.hbm %s651_s2, %s281_s14  ;;  %s191_s7 = int_to_ptr.vmem [resolvable:$true] %s190_s7 }
  0x48   : > { %s177_s22 = scalar_lea.sflag [#allocation4], %s602_s5  ;;  %s395_s23 = scalar_lea.vmem %s191_s7, 128 }
  0x49   : > { %175 = vst [vmem:[%s171_s17] sm:$0xff] %v174_v2  ;;  %p396_p9 = scmp.ne.s32.totalorder %s191_s7, %s395_s23  ;;  %p668_p11 = scmp.ne.s32.totalorder %s662_s29, 0 }
  0x4a   : > { %s467_s24 = smov [#allocation7]  }
  0x4b   : > { %p397_p13 = pnand %p396_p9, %p668_p11  ;;  %s399_s25 = sshll.u32 %s467_s24, 4  ;;  %s400_s25 = int_to_ptr.vmem [resolvable:$false] %s399_s25 }
  0x4c   : > { %s401_s26 = scalar_lea.vmem %s400_s25, 256  ;;  %p402_p1 = scmp.lt.s32.totalorder %s191_s7, %s400_s25 }
  0x4d   : > { %p398_p10 = pneg %p397_p13  ;;  %p403_p2 = scmp.lt.s32.totalorder %s401_s26, %s395_s23 }
  0x4f   : > { %p404_p0 = por %p403_p2, %p402_p1 }
  0x51   : > { %p405_p3 = pnand %p404_p0, %p398_p10 }
  0x53   : > { %408 = shalt.err (!%p405_p3)
}
  0x54   : > { %s409_s13 = scalar_lea.hbm %s188_s15, 128  ;;  %s413_s3 = scalar_lea.hbm %s651_s2, 256 }
  0x55   : > { %p410_p12 = scmp.ne.s32.totalorder %s188_s15, %s409_s13  ;;  %p414_p6 = scmp.lt.s32.totalorder %s188_s15, %s651_s2 }
  0x56   : > { %p415_p4 = scmp.lt.s32.totalorder %s413_s3, %s409_s13 }
  0x57   : > { %p411_p5 = pnand %p410_p12, %p668_p11 }
  0x58   : > { %p416_p8 = por %p415_p4, %p414_p6 }
  0x59   : > { %p412_p7 = pneg %p411_p5 }
  0x5b   : > { %p417_p9 = pnand %p416_p8, %p412_p7 }
  0x5d   : > { %420 = shalt.err (!%p417_p9)
}
  0x5e   : > { %290 = dma.vmem_to_hbm [thread:$0]  (%p668_p11), %s191_s7, 128, %s188_s15, %s177_s22  }
  0x5f PF: > { %s202_s6 = sand.u32 1, %s451_s9   ;;  %p669_p13 = scmp.ne.s32.totalorder %s657_s16, 0 }
  0x60   : > { %p670_p10 = scmp.ge.s32.totalorder %s463_s12, 2  ;;  %s203_s8 = scalar_lea.sflag [#allocation4], %s202_s6 }
  0x62   : > { %p301_p1 = pnand %p670_p10, %p669_p13 }
  0x64   : > { %p302_p2 = pneg %p301_p1 }
  0x66   : > { %446 = dma.done.wait (%p302_p2), %s203_s8, 128  }
  0x67   : > { %448 = vsyncadd (%p302_p2), %s203_s8, 4294967168  ;;  %p16_p0 = scmp.ge.s32.totalorder %s531_s20, 4   ;;  %s671_s9 = smov %s455_s10 }
  0x68   : > { %s672_s10 = smov %s459_s11  ;;  %s673_s11 = smov %s558_s28 }
  0x69   : > { %s674_s12 = smov %s531_s20  ;;  %18 = sbr.rel (!%p16_p0) target bundleno = 6 (0x6), region = 77 }
  0x6e   :  { %208 = vsyncpa [#allocation3], 1 }
  0x6f   :  { %210 = vsyncpa [#allocation3 + $0x1], 1 }
  0x70   :  { %211 = vsyncpa [#allocation6], 1 }
  0x71   :  { %212 = vsyncpa [#allocation4], 1 }
  0x72   :  { %214 = vsyncpa [#allocation4 + $0x1], 1 }

// kernel: tpu_custom_call.1
= control target key start
LH: loop header
LB: loop body
LE: loop exit
PB: predicated region body
PF: predicated region fallthrough
CT: control target
= control target key end

     0   :  { %s4131_s0 = inlined_call_operand.hbm [shape: f32[8,32], index: 0, kind: input, shape index: {}]   ;;  %s4132_s1 = inlined_call_operand.hbm [shape: f32[8,32], index: 1, kind: input, shape index: {}]   ;;  %s4133_s2 = inlined_call_operand.vmem [shape: f32[32,128], index: 2, kind: input, shape index: {}]   ;;  %s4134_s3 = inlined_call_operand.vmem [shape: f32[128,128], index: 3, kind: input, shape index: {}]   ;;  %s4135_s4 = inlined_call_operand.hbm [shape: f32[128,128], index: 4, kind: input, shape index: {}]   ;;  %s4136_s5 = inlined_call_operand.hbm [shape: f32[128,128], index: 5, kind: input, shape index: {}]   ;;  %s4137_s6 = inlined_call_operand.hbm [shape: f32[128,128], index: 6, kind: input, shape index: {}]   ;;  %s4138_s7 = inlined_call_operand.hbm [shape: f32[128,128], index: 7, kind: input, shape index: {}]   ;;  %s4139_s8 = inlined_call_operand.hbm [shape: f32[128,128], index: 8, kind: input, shape index: {}]   ;;  %s4140_s9 = inlined_call_operand.hbm [shape: f32[128,128], index: 9, kind: input, shape index: {}]   ;;  %s4141_s10 = inlined_call_operand.hbm [shape: f32[128,128], index: 10, kind: input, shape index: {}]   ;;  %s4142_s11 = inlined_call_operand.vmem [shape: f32[128,32], index: 11, kind: input, shape index: {}]   ;;  %s4143_s12 = inlined_call_operand.vmem [shape: f32[10,128], index: 12, kind: input, shape index: {}]   ;;  %s4144_s13 = inlined_call_operand.vmem [shape: f32[8,2], index: 13, kind: output, shape index: {0}]   ;;  %s4145_s14 = inlined_call_operand.vmem [shape: f32[8,2], index: 14, kind: output, shape index: {1}]   ;;  %s4146_s15 = inlined_call_operand.hbm [shape: f32[8,32], index: 15, kind: output, shape index: {2}]   ;;  %s4147_s16 = inlined_call_operand.hbm [shape: f32[8,32], index: 16, kind: output, shape index: {3}]  }
   0x1   :  { %4148 = sst [smem:[#allocation27_spill]] %s4131_s0 }
   0x2   :  { %22 = vsyncpa [#allocation3], 0 }
   0x3   :  { %23 = vsyncpa [#allocation6], 0 }
   0x4   :  { %24 = vsyncpa [#allocation9], 0 }
   0x5   :  { %25 = vsyncpa [#allocation12], 0 }
   0x6   :  { %26 = vsyncpa [#allocation15], 0 }
   0x7   :  { %27 = vsyncpa [#allocation4], 0 }
   0x8   :  { %28 = vsyncpa [#allocation19], 0  ;;  %s3274_s21 = smov [#allocation5]  }
   0x9   :  { %s45_s22 = sshll.u32 %s3274_s21, 4  ;;  %s46_s22 = int_to_ptr.vmem [resolvable:$true] %s45_s22 }
   0xa   :  { %s3048_s23 = scalar_lea.vmem %s46_s22, 128  ;;  %p3053_p1 = scmp.lt.s32.totalorder %s46_s22, %s46_s22 }
   0xb   :  { %p3049_p0 = scmp.ne.s32.totalorder %s46_s22, %s3048_s23  ;;  %p3054_p2 = scmp.lt.s32.totalorder %s3048_s23, %s3048_s23 }
   0xd   :  { %p3055_p3 = por %p3054_p2, %p3053_p1 }
   0xf   :  { %p3056_p4 = pnand %p3055_p3, %p3049_p0 }
  0x11   :  { %3059 = shalt.err (!%p3056_p4)
}
  0x12   :  { %48 = dma.hbm_to_vmem [thread:$0]  %s4132_s1, 128, %s46_s22, [#allocation6]  }
  0x13   :  { %s3275_s26 = smov [#allocation8]   ;;  %s3276_s28 = smov [#allocation11]  }
  0x14   :  { %s70_s27 = sshll.u32 %s3275_s26, 4  ;;  %s94_s29 = sshll.u32 %s3276_s28, 4  ;;  %s71_s27 = int_to_ptr.vmem [resolvable:$true] %s70_s27  ;;  %s95_s29 = int_to_ptr.vmem [resolvable:$true] %s94_s29 }
  0x15   :  { %s3068_s30 = scalar_lea.vmem %s71_s27, 2048  ;;  %p3073_p6 = scmp.lt.s32.totalorder %s71_s27, %s71_s27 }
  0x16   :  { %p3069_p5 = scmp.ne.s32.totalorder %s71_s27, %s3068_s30  ;;  %p3074_p7 = scmp.lt.s32.totalorder %s3068_s30, %s3068_s30 }
  0x18   :  { %p3075_p8 = por %p3074_p7, %p3073_p6 }
  0x1a   :  { %p3076_p9 = pnand %p3075_p8, %p3069_p5 }
  0x1c   :  { %3079 = shalt.err (!%p3076_p9)
}
  0x1d   :  { %s3277_s0 = smov 128   ;;  %s3278_s17 = smov 8  }
  0x1e   :  { %76 = dma.hbm_to_vmem [thread:$0]  %s4136_s5, 2048, %s71_s27, [#allocation9], %s3277_s0, %s3277_s0, %s3278_s17  }
  0x1f   :  { %s3088_s1 = scalar_lea.vmem %s95_s29, 2048  ;;  %p3093_p11 = scmp.lt.s32.totalorder %s95_s29, %s95_s29 }
  0x20   :  { %p3089_p10 = scmp.ne.s32.totalorder %s95_s29, %s3088_s1  ;;  %p3094_p12 = scmp.lt.s32.totalorder %s3088_s1, %s3088_s1 }
  0x22   :  { %p3095_p13 = por %p3094_p12, %p3093_p11 }
  0x24   :  { %p3096_p0 = pnand %p3095_p13, %p3089_p10 }
  0x26   :  { %3099 = shalt.err (!%p3096_p0)
}
  0x27   :  { %100 = dma.hbm_to_vmem [thread:$0]  %s4138_s7, 2048, %s95_s29, [#allocation12], %s3277_s0, %s3277_s0, %s3278_s17  }
  0x28   :  { %s3279_s22 = smov [#allocation14]   ;;  %s3280_s24 = smov [#allocation2]  }
  0x29   :  { %s118_s23 = sshll.u32 %s3279_s22, 4  ;;  %s35_s5 = sshll.u32 %s3280_s24, 4  ;;  %s119_s23 = int_to_ptr.vmem [resolvable:$true] %s118_s23  ;;  %s36_s5 = int_to_ptr.vmem [resolvable:$true] %s35_s5 }
  0x2a   :  { %s3108_s25 = scalar_lea.vmem %s119_s23, 2048  ;;  %p3113_p2 = scmp.lt.s32.totalorder %s119_s23, %s119_s23 }
  0x2b   :  { %p3109_p1 = scmp.ne.s32.totalorder %s119_s23, %s3108_s25  ;;  %p3114_p3 = scmp.lt.s32.totalorder %s3108_s25, %s3108_s25 }
  0x2d   :  { %p3115_p4 = por %p3114_p3, %p3113_p2 }
  0x2f   :  { %p3116_p5 = pnand %p3115_p4, %p3109_p1 }
  0x31   :  { %3119 = shalt.err (!%p3116_p5)
}
  0x32   :  { %124 = dma.hbm_to_vmem [thread:$0]  %s4140_s9, 2048, %s119_s23, [#allocation15], %s3277_s0, %s3277_s0, %s3278_s17  }
  0x33   :  { %s3128_s7 = scalar_lea.vmem %s36_s5, 128  ;;  %p3133_p7 = scmp.lt.s32.totalorder %s36_s5, %s36_s5 }
  0x34   :  { %p3129_p6 = scmp.ne.s32.totalorder %s36_s5, %s3128_s7  ;;  %p3134_p8 = scmp.lt.s32.totalorder %s3128_s7, %s3128_s7 }
  0x36   :  { %p3135_p9 = por %p3134_p8, %p3133_p7 }
  0x38   :  { %p3136_p10 = pnand %p3135_p9, %p3129_p6 }
  0x3a   :  { %3139 = shalt.err (!%p3136_p10)
}
  0x3b   :  { %s4149_s30 = sld [smem:[#allocation27_spill]]  ;;  %s3281_s18 = smov [#allocation7]  }
  0x3c   :  { %s58_s19 = sshll.u32 %s3281_s18, 4  ;;  %s3282_s1 = smov [#allocation10]   ;;  %s59_s19 = int_to_ptr.vmem [resolvable:$true] %s58_s19 }
  0x3d   :  { %s82_s20 = sshll.u32 %s3282_s1, 4  ;;  %s3148_s21 = scalar_lea.vmem %s59_s19, 2048  ;;  %s83_s20 = int_to_ptr.vmem [resolvable:$true] %s82_s20 }
  0x3e   :  { %p3149_p11 = scmp.ne.s32.totalorder %s59_s19, %s3148_s21  ;;  %p3153_p12 = scmp.lt.s32.totalorder %s59_s19, %s59_s19 }
  0x3f   :  { %p3154_p13 = scmp.lt.s32.totalorder %s3148_s21, %s3148_s21 }
  0x41   :  { %38 = dma.hbm_to_vmem [thread:$0]  %s4149_s30, 128, %s36_s5, [#allocation3]  }
  0x42   :  { %p3155_p0 = por %p3154_p13, %p3153_p12 }
  0x44   :  { %p3156_p1 = pnand %p3155_p0, %p3149_p11 }
  0x46   :  { %3159 = shalt.err (!%p3156_p1)
}
  0x47   :  { %64 = dma.hbm_to_vmem [thread:$0]  %s4135_s4, 2048, %s59_s19, [#allocation6], %s3277_s0, %s3277_s0, %s3278_s17  }
  0x48   :  { %s3168_s23 = scalar_lea.vmem %s83_s20, 2048  ;;  %p3173_p3 = scmp.lt.s32.totalorder %s83_s20, %s83_s20 }
  0x49   :  { %p3169_p2 = scmp.ne.s32.totalorder %s83_s20, %s3168_s23  ;;  %p3174_p4 = scmp.lt.s32.totalorder %s3168_s23, %s3168_s23 }
  0x4b   :  { %p3175_p5 = por %p3174_p4, %p3173_p3 }
  0x4d   :  { %p3176_p6 = pnand %p3175_p5, %p3169_p2 }
  0x4f   :  { %3179 = shalt.err (!%p3176_p6)
}
  0x50   :  { %88 = dma.hbm_to_vmem [thread:$0]  %s4137_s6, 2048, %s83_s20, [#allocation9], %s3277_s0, %s3277_s0, %s3278_s17  }
  0x51   :  { %s3283_s25 = smov [#allocation13]   ;;  %s3284_s27 = smov [#allocation16]  }
  0x52   :  { %s106_s26 = sshll.u32 %s3283_s25, 4  ;;  %s130_s4 = sshll.u32 %s3284_s27, 4  ;;  %s107_s26 = int_to_ptr.vmem [resolvable:$true] %s106_s26  ;;  %s131_s4 = int_to_ptr.vmem [resolvable:$true] %s130_s4 }
  0x53   :  { %s3188_s7 = scalar_lea.vmem %s107_s26, 2048  ;;  %p3193_p8 = scmp.lt.s32.totalorder %s107_s26, %s107_s26 }
  0x54   :  { %p3189_p7 = scmp.ne.s32.totalorder %s107_s26, %s3188_s7  ;;  %p3194_p9 = scmp.lt.s32.totalorder %s3188_s7, %s3188_s7 }
  0x56   :  { %p3195_p10 = por %p3194_p9, %p3193_p8 }
  0x58   :  { %p3196_p11 = pnand %p3195_p10, %p3189_p7 }
  0x5a   :  { %3199 = shalt.err (!%p3196_p11)
}
  0x5b   :  { %112 = dma.hbm_to_vmem [thread:$0]  %s4139_s8, 2048, %s107_s26, [#allocation12], %s3277_s0, %s3277_s0, %s3278_s17  }
  0x5c   :  { %s3208_s6 = scalar_lea.vmem %s131_s4, 2048  ;;  %p3213_p13 = scmp.lt.s32.totalorder %s131_s4, %s131_s4 }
  0x5d   :  { %p3209_p12 = scmp.ne.s32.totalorder %s131_s4, %s3208_s6  ;;  %p3214_p0 = scmp.lt.s32.totalorder %s3208_s6, %s3208_s6 }
  0x5f   :  { %p3215_p1 = por %p3214_p0, %p3213_p13 }
  0x61   :  { %p3216_p2 = pnand %p3215_p1, %p3209_p12 }
  0x63   :  { %3219 = shalt.err (!%p3216_p2)
}
  0x64   :  { %136 = dma.hbm_to_vmem [thread:$0]  %s4141_s10, 2048, %s131_s4, [#allocation15], %s3277_s0, %s3277_s0, %s3278_s17  }
  0x65   :  { %3260 = dma.done.wait [#allocation3], 128  }
  0x66   :  { %3261 = vsyncadd [#allocation3], 4294967168 }
  0x67   :  { %3262 = dma.done.wait [#allocation6], 2176  }
  0x68   :  { %3263 = vsyncadd [#allocation6], 4294965120 }
  0x69   :  { %3264 = dma.done.wait [#allocation9], 4096  }
  0x6a   :  { %3265 = vsyncadd [#allocation9], 4294963200 }
  0x6b   :  { %3266 = dma.done.wait [#allocation12], 4096  }
  0x6c   :  { %3267 = vsyncadd [#allocation12], 4294963200 }
  0x6d   :  { %3268 = dma.done.wait [#allocation15], 4096  }
  0x6e   :  { %3269 = vsyncadd [#allocation15], 4294963200  ;;  %v3285_v0 = vmov 0.0   ;;  %vm3286_vm0 = vmmov 0   ;;  %v3431_v1 = vld [vmem:[%s4133_s2 + $0x18] sm:$0xff]  ;;  %v3436_v2 = vld [vmem:[%s4133_s2 + $0x10] sm:$0xff] }
  0x6f   :  { %2373 = vmatprep.subr.mxu1 %v3285_v0  ;;  %2381 = vmatprep.mubr.msk.f32.mxu1 %vm3286_vm0, %v3285_v0  ;;  %v3443_v3 = vld [vmem:[%s4133_s2 + $0x8] sm:$0xff]  ;;  %v3450_v4 = vld [vmem:[%s4133_s2] sm:$0xff]  ;;  %vm178_vm1 = vcmask 261120   ;;  %v3457_v6 = vld [vmem:[%s4134_s3 + $0x78] sm:$0xff]  ;;  %vm620_vm2 = vcmask 15360   ;;  %s3287_s20 = smov [#allocation17]  }
  0x70   :  { %2419 = vmatprep.subr.mxu0 %v3285_v0  ;;  %2451 = vmatprep.mubr.msk.f32.mxu0 %vm3286_vm0, %v3285_v0  ;;  %v168_v5 = vld [vmem:[#allocation2] sm:$0xff]  ;;  %v3465_v7 = vld [vmem:[%s4134_s3 + $0x70] sm:$0xff]  ;;  %v3474_v8 = vld [vmem:[%s4134_s3 + $0x68] sm:$0xff]  ;;  %s2004_s21 = sshll.u32 %s3287_s20, 4  ;;  %s2005_s21 = int_to_ptr.vmem [resolvable:$true] %s2004_s21 }
  0x71   :  { %2374 = vmatpush3.msra.mxu1 %v3431_v1  ;;  %v3481_v9 = vld [vmem:[%s4134_s3 + $0x60] sm:$0xff]  ;;  %v3488_v10 = vld [vmem:[%s4134_s3 + $0x58] sm:$0xff]  ;;  %v3495_v11 = vld [vmem:[%s4134_s3 + $0x50] sm:$0xff]  ;;  %s3220_s9 = scalar_lea.vmem %s2005_s21, 128  ;;  %p3225_p4 = scmp.lt.s32.totalorder %s2005_s21, %s2005_s21 }
  0x72   :  { %2375 = vmatprep.subr.mxu1 %v3285_v0  ;;  %v3502_v12 = vld [vmem:[%s4134_s3 + $0x48] sm:$0xff]  ;;  %v3509_v13 = vld [vmem:[%s4134_s3 + $0x40] sm:$0xff]  ;;  %v3516_v14 = vld [vmem:[%s4134_s3 + $0x38] sm:$0xff]  ;;  %p3221_p3 = scmp.ne.s32.totalorder %s2005_s21, %s3220_s9  ;;  %p3226_p5 = scmp.lt.s32.totalorder %s3220_s9, %s3220_s9 }
  0x73   :  { %2376 = vmatpush3.msra.mxu1 %v3436_v2  ;;  %v3523_v15 = vld [vmem:[%s4134_s3 + $0x30] sm:$0xff]  ;;  %v3530_v16 = vld [vmem:[%s4134_s3 + $0x28] sm:$0xff]  ;;  %v3537_v17 = vld [vmem:[%s4134_s3 + $0x20] sm:$0xff] }
  0x74   :  { %2377 = vmatprep.subr.mxu1 %v3285_v0  ;;  %v3544_v18 = vld [vmem:[%s4134_s3 + $0x18] sm:$0xff]  ;;  %v3553_v19 = vld [vmem:[%s4134_s3 + $0x10] sm:$0xff]  ;;  %v3560_v20 = vld [vmem:[%s4134_s3 + $0x8] sm:$0xff]  ;;  %p3227_p6 = por %p3226_p5, %p3225_p4 }
  0x75   :  { %2378 = vmatpush3.msra.mxu1 %v3443_v3  ;;  %v3567_v21 = vld [vmem:[%s4134_s3] sm:$0xff]  ;;  %v3570_v22 = vld [vmem:[#allocation7 + $0x78] sm:$0xff]  ;;  %v3577_v24 = vld [vmem:[#allocation7 + $0x68] sm:$0xff] }
  0x76   :  { %2379 = vmatprep.subr.mxu1 %v3285_v0  ;;  %v3572_v23 = vld [vmem:[#allocation7 + $0x70] sm:$0xff]  ;;  %2420 = vmatpush3.msra.mxu0 %v3570_v22  ;;  %v3581_v25 = vld [vmem:[#allocation7 + $0x60] sm:$0xff]  ;;  %v3585_v26 = vld [vmem:[#allocation7 + $0x58] sm:$0xff]  ;;  %p3228_p7 = pnand %p3227_p6, %p3221_p3 }
  0x77   :  { %2380 = vmatpush3.msra.mxu1 %v3450_v4  ;;  %2421 = vmatprep.subr.mxu0 %v3285_v0  ;;  %v3589_v27 = vld [vmem:[#allocation7 + $0x50] sm:$0xff]  ;;  %v3593_v28 = vld [vmem:[#allocation7 + $0x48] sm:$0xff]  ;;  %v3597_v29 = vld [vmem:[#allocation7 + $0x40] sm:$0xff] }
  0x78   :  { %2382 = vmatmul.mubr.msk.f32.vlgmr.msra.gmra.mxu1 %vm178_vm1, %v168_v5  ;;  %2384 = vmatprep.subr.mxu1 %v3285_v0  ;;  %v3601_v30 = vld [vmem:[#allocation7 + $0x38] sm:$0xff]  ;;  %v3605_v31 = vld [vmem:[#allocation7 + $0x30] sm:$0xff]  ;;  %v350_v32 = vld [vmem:[#allocation7 + $0x28] sm:$0xff] }
  0x79   :  { %2385 = vmatpush3.msra.mxu1 %v3457_v6  ;;  %2416 = vmatprep.mubr.msk.f32.mxu1 %vm3286_vm0, %v3285_v0  ;;  %v349_v33 = vld [vmem:[#allocation7 + $0x20] sm:$0xff]  ;;  %v348_v34 = vld [vmem:[#allocation7 + $0x18] sm:$0xff]  ;;  %v3617_v35 = vld [vmem:[%s4143_s12] ss:$0 sm:$0xff] }
  0x7a   :  { %2386 = vmatprep.subr.mxu1 %v3285_v0  ;;  %2422 = vmatpush3.msra.mxu0 %v3572_v23  ;;  %v347_v40 = vld [vmem:[#allocation7 + $0x10] sm:$0xff]  ;;  %v346_v41 = vld [vmem:[#allocation7 + $0x8] sm:$0xff]  ;;  %v345_v42 = vld [vmem:[#allocation7] sm:$0xff] }
  0x7b   :  { %2387 = vmatpush3.msra.mxu1 %v3465_v7  ;;  %2423 = vmatprep.subr.mxu0 %v3285_v0  ;;  %v452_v43 = vld [vmem:[#allocation8 + $0x78] sm:$0xff]  ;;  %v451_v44 = vld [vmem:[#allocation8 + $0x70] sm:$0xff]  ;;  %v450_v45 = vld [vmem:[#allocation8 + $0x68] sm:$0xff] }
  0x7c   :  { %2388 = vmatprep.subr.mxu1 %v3285_v0  ;;  %2424 = vmatpush3.msra.mxu0 %v3577_v24  ;;  %v449_v46 = vld [vmem:[#allocation8 + $0x60] sm:$0xff]  ;;  %v448_v47 = vld [vmem:[#allocation8 + $0x58] sm:$0xff]  ;;  %v447_v48 = vld [vmem:[#allocation8 + $0x50] sm:$0xff] }
  0x7d   :  { %2389 = vmatpush3.msra.mxu1 %v3474_v8  ;;  %2425 = vmatprep.subr.mxu0 %v3285_v0  ;;  %v446_v49 = vld [vmem:[#allocation8 + $0x48] sm:$0xff]  ;;  %v445_v50 = vld [vmem:[#allocation8 + $0x40] sm:$0xff]  ;;  %v444_v51 = vld [vmem:[#allocation8 + $0x38] sm:$0xff] }
  0x7e   :  { %2390 = vmatprep.subr.mxu1 %v3285_v0  ;;  %2426 = vmatpush3.msra.mxu0 %v3581_v25  ;;  %v443_v52 = vld [vmem:[#allocation8 + $0x30] sm:$0xff]  ;;  %v442_v53 = vld [vmem:[#allocation8 + $0x28] sm:$0xff]  ;;  %v441_v54 = vld [vmem:[#allocation8 + $0x20] sm:$0xff] }
  0x7f   :  { %2391 = vmatpush3.msra.mxu1 %v3481_v9  ;;  %2427 = vmatprep.subr.mxu0 %v3285_v0  ;;  %v440_v55 = vld [vmem:[#allocation8 + $0x18] sm:$0xff]  ;;  %v2037_v56 = vld [vmem:[%s4143_s12 + $0x1] ss:$0 sm:$0xff]  ;;  %v438_v62 = vld [vmem:[#allocation8 + $0x8] sm:$0xff] }
  0x80   :  { %2392 = vmatprep.subr.mxu1 %v3285_v0  ;;  %2428 = vmatpush3.msra.mxu0 %v3585_v26  ;;  %v439_v61 = vld [vmem:[#allocation8 + $0x10] sm:$0xff]  ;;  %v437_v63 = vld [vmem:[#allocation8] sm:$0xff]  ;;  %v544_v5 = vld [vmem:[#allocation10 + $0x78] sm:$0xff] }
  0x81   :  { %2393 = vmatpush3.msra.mxu1 %v3488_v10  ;;  %2429 = vmatprep.subr.mxu0 %v3285_v0 }
  0x82   :  { %2394 = vmatprep.subr.mxu1 %v3285_v0  ;;  %2430 = vmatpush3.msra.mxu0 %v3589_v27 }
  0x83   :  { %2395 = vmatpush3.msra.mxu1 %v3495_v11  ;;  %2431 = vmatprep.subr.mxu0 %v3285_v0 }
  0x84   :  { %2396 = vmatprep.subr.mxu1 %v3285_v0  ;;  %2432 = vmatpush3.msra.mxu0 %v3593_v28 }
  0x85   :  { %2397 = vmatpush3.msra.mxu1 %v3502_v12  ;;  %2433 = vmatprep.subr.mxu0 %v3285_v0 }
  0x86   :  { %2398 = vmatprep.subr.mxu1 %v3285_v0  ;;  %2434 = vmatpush3.msra.mxu0 %v3597_v29 }
  0x87   :  { %2399 = vmatpush3.msra.mxu1 %v3509_v13  ;;  %2435 = vmatprep.subr.mxu0 %v3285_v0 }
  0x88   :  { %2400 = vmatprep.subr.mxu1 %v3285_v0  ;;  %2436 = vmatpush3.msra.mxu0 %v3601_v30 }
  0x89   :  { %2401 = vmatpush3.msra.mxu1 %v3516_v14  ;;  %2437 = vmatprep.subr.mxu0 %v3285_v0 }
  0x8a   :  { %2402 = vmatprep.subr.mxu1 %v3285_v0  ;;  %2438 = vmatpush3.msra.mxu0 %v3605_v31 }
  0x8b   :  { %2403 = vmatpush3.msra.mxu1 %v3523_v15  ;;  %2439 = vmatprep.subr.mxu0 %v3285_v0 }
  0x8c   :  { %2404 = vmatprep.subr.mxu1 %v3285_v0  ;;  %2440 = vmatpush3.msra.mxu0 %v350_v32  ;;  %v543_v32 = vld [vmem:[#allocation10 + $0x70] sm:$0xff] }
  0x8d   :  { %2405 = vmatpush3.msra.mxu1 %v3530_v16  ;;  %2441 = vmatprep.subr.mxu0 %v3285_v0 }
  0x8e   :  { %2406 = vmatprep.subr.mxu1 %v3285_v0  ;;  %2442 = vmatpush3.msra.mxu0 %v349_v33  ;;  %v542_v33 = vld [vmem:[#allocation10 + $0x68] sm:$0xff] }
  0x8f   :  { %2407 = vmatpush3.msra.mxu1 %v3537_v17  ;;  %2443 = vmatprep.subr.mxu0 %v3285_v0 }
  0x90   :  { %2408 = vmatprep.subr.mxu1 %v3285_v0  ;;  %2444 = vmatpush3.msra.mxu0 %v348_v34  ;;  %v541_v34 = vld [vmem:[#allocation10 + $0x60] sm:$0xff] }
  0x91   :  { %2409 = vmatpush3.msra.mxu1 %v3544_v18  ;;  %2445 = vmatprep.subr.mxu0 %v3285_v0 }
  0x92   :  { %2410 = vmatprep.subr.mxu1 %v3285_v0  ;;  %2446 = vmatpush3.msra.mxu0 %v347_v40  ;;  %v536_v40 = vld [vmem:[#allocation10 + $0x38] sm:$0xff] }
  0x93   :  { %2411 = vmatpush3.msra.mxu1 %v3553_v19  ;;  %2447 = vmatprep.subr.mxu0 %v3285_v0 }
  0x94   :  { %2412 = vmatprep.subr.mxu1 %v3285_v0  ;;  %2448 = vmatpush3.msra.mxu0 %v346_v41  ;;  %v535_v41 = vld [vmem:[#allocation10 + $0x30] sm:$0xff] }
  0x95   :  { %2413 = vmatpush3.msra.mxu1 %v3560_v20  ;;  %2449 = vmatprep.subr.mxu0 %v3285_v0 }
  0x96   :  { %2414 = vmatprep.subr.mxu1 %v3285_v0  ;;  %2450 = vmatpush3.msra.mxu0 %v345_v42  ;;  %v534_v42 = vld [vmem:[#allocation10 + $0x28] sm:$0xff] }
  0x97   :  { %2415 = vmatpush3.msra.mxu1 %v3567_v21  ;;  %2489 = vmatprep.subr.mxu0 %v3285_v0 }
  0x98   :  { %2454 = vmatprep.subr.mxu1 %v3285_v0 }
 0x138   :  { %v248_v36 = vpop.f32.mrf.mxu1 }
 0x139   :  { %v249_v37 = vadd.f32 %v3617_v35, %v248_v36  ;;  %v540_v36 = vld [vmem:[#allocation10 + $0x58] sm:$0xff] }
 0x13a   :  { %v2383_v38 = vpop.f32.mrf.mxu1 }
 0x13b   :  { %v252_v39 = vmax.f32 %v249_v37, 0.0  ;;  %v539_v37 = vld [vmem:[#allocation10 + $0x50] sm:$0xff]  ;;  %v538_v38 = vld [vmem:[#allocation10 + $0x48] sm:$0xff] }
 0x13d   :  { %2417 = vmatmul.mubr.f32.vlgmr.msra.gmra.mxu1 %v252_v39  ;;  %v537_v39 = vld [vmem:[#allocation10 + $0x40] sm:$0xff] }
 0x13e   :  { %2486 = vmatprep.mubr.msk.f32.mxu1 %vm3286_vm0, %v3285_v0  ;;  %2455 = vmatpush3.msra.mxu1 %v452_v43  ;;  %v533_v43 = vld [vmem:[#allocation10 + $0x20] sm:$0xff] }
 0x13f   :  { %2456 = vmatprep.subr.mxu1 %v3285_v0 }
 0x140   :  { %2457 = vmatpush3.msra.mxu1 %v451_v44  ;;  %v532_v44 = vld [vmem:[#allocation10 + $0x18] sm:$0xff] }
 0x141   :  { %2458 = vmatprep.subr.mxu1 %v3285_v0 }
 0x142   :  { %2459 = vmatpush3.msra.mxu1 %v450_v45  ;;  %v2038_v45 = vld [vmem:[%s4143_s12 + $0x2] ss:$0 sm:$0xff] }
 0x143   :  { %2460 = vmatprep.subr.mxu1 %v3285_v0 }
 0x144   :  { %2461 = vmatpush3.msra.mxu1 %v449_v46 }
 0x145   :  { %2462 = vmatprep.subr.mxu1 %v3285_v0 }
 0x146   :  { %2463 = vmatpush3.msra.mxu1 %v448_v47 }
 0x147   :  { %2464 = vmatprep.subr.mxu1 %v3285_v0 }
 0x148   :  { %2465 = vmatpush3.msra.mxu1 %v447_v48 }
 0x149   :  { %2466 = vmatprep.subr.mxu1 %v3285_v0 }
 0x14a   :  { %2467 = vmatpush3.msra.mxu1 %v446_v49 }
 0x14b   :  { %2468 = vmatprep.subr.mxu1 %v3285_v0 }
 0x14c   :  { %2469 = vmatpush3.msra.mxu1 %v445_v50  ;;  %v531_v50 = vld [vmem:[#allocation10 + $0x10] sm:$0xff] }
 0x14d   :  { %2470 = vmatprep.subr.mxu1 %v3285_v0 }
 0x14e   :  { %2471 = vmatpush3.msra.mxu1 %v444_v51  ;;  %v530_v51 = vld [vmem:[#allocation10 + $0x8] sm:$0xff] }
 0x14f   :  { %2472 = vmatprep.subr.mxu1 %v3285_v0 }
 0x150   :  { %2473 = vmatpush3.msra.mxu1 %v443_v52  ;;  %v529_v52 = vld [vmem:[#allocation10] sm:$0xff] }
 0x151   :  { %2474 = vmatprep.subr.mxu1 %v3285_v0 }
 0x152   :  { %2475 = vmatpush3.msra.mxu1 %v442_v53  ;;  %v637_v53 = vld [vmem:[#allocation11 + $0x78] sm:$0xff] }
 0x153   :  { %2476 = vmatprep.subr.mxu1 %v3285_v0 }
 0x154   :  { %2477 = vmatpush3.msra.mxu1 %v441_v54  ;;  %v636_v54 = vld [vmem:[#allocation11 + $0x70] sm:$0xff] }
 0x155   :  { %2478 = vmatprep.subr.mxu1 %v3285_v0 }
 0x156   :  { %2479 = vmatpush3.msra.mxu1 %v440_v55  ;;  %v635_v55 = vld [vmem:[#allocation11 + $0x68] sm:$0xff] }
 0x157   :  { %2480 = vmatprep.subr.mxu1 %v3285_v0 }
 0x158   :  { %2481 = vmatpush3.msra.mxu1 %v439_v61  ;;  %v629_v61 = vld [vmem:[#allocation11 + $0x38] sm:$0xff] }
 0x159   :  { %2482 = vmatprep.subr.mxu1 %v3285_v0 }
 0x15a   :  { %2483 = vmatpush3.msra.mxu1 %v438_v62  ;;  %v628_v62 = vld [vmem:[#allocation11 + $0x30] sm:$0xff] }
 0x15b   :  { %2484 = vmatprep.subr.mxu1 %v3285_v0 }
 0x15c   :  { %2485 = vmatpush3.msra.mxu1 %v437_v63  ;;  %v627_v63 = vld [vmem:[#allocation11 + $0x28] sm:$0xff] }
 0x15d   :  { %2524 = vmatprep.subr.mxu1 %v3285_v0 }
 0x1fd   :  { %v340_v57 = vpop.f32.mrf.mxu1 }
 0x1fe   :  { %v341_v58 = vadd.f32 %v2037_v56, %v340_v57  ;;  %v634_v56 = vld [vmem:[#allocation11 + $0x60] sm:$0xff]  ;;  %v633_v57 = vld [vmem:[#allocation11 + $0x58] sm:$0xff] }
 0x1ff   :  { %v2418_v59 = vpop.f32.mrf.mxu1 }
 0x200   :  { %v344_v60 = vmax.f32 %v341_v58, 0.0  ;;  %v632_v58 = vld [vmem:[#allocation11 + $0x50] sm:$0xff]  ;;  %v631_v59 = vld [vmem:[#allocation11 + $0x48] sm:$0xff] }
 0x202   :  { %2452 = vmatmul.mubr.f32.vlgmr.msra.gmra.mxu0 %v344_v60  ;;  %v630_v60 = vld [vmem:[#allocation11 + $0x40] sm:$0xff] }
 0x203   :  { %2521 = vmatprep.mubr.msk.f32.mxu0 %vm3286_vm0, %v3285_v0  ;;  %2490 = vmatpush3.msra.mxu0 %v544_v5  ;;  %v626_v5 = vld [vmem:[#allocation11 + $0x20] sm:$0xff] }
 0x204   :  { %2491 = vmatprep.subr.mxu0 %v3285_v0 }
 0x205   :  { %2492 = vmatpush3.msra.mxu0 %v543_v32  ;;  %v625_v32 = vld [vmem:[#allocation11 + $0x18] sm:$0xff] }
 0x206   :  { %2493 = vmatprep.subr.mxu0 %v3285_v0 }
 0x207   :  { %2494 = vmatpush3.msra.mxu0 %v542_v33  ;;  %v624_v33 = vld [vmem:[#allocation11 + $0x10] sm:$0xff] }
 0x208   :  { %2495 = vmatprep.subr.mxu0 %v3285_v0 }
 0x209   :  { %2496 = vmatpush3.msra.mxu0 %v541_v34  ;;  %v2039_v34 = vld [vmem:[%s4143_s12 + $0x3] ss:$0 sm:$0xff] }
 0x20a   :  { %2497 = vmatprep.subr.mxu0 %v3285_v0 }
 0x20b   :  { %2498 = vmatpush3.msra.mxu0 %v540_v36 }
 0x20c   :  { %2499 = vmatprep.subr.mxu0 %v3285_v0 }
 0x20d   :  { %2500 = vmatpush3.msra.mxu0 %v539_v37 }
 0x20e   :  { %2501 = vmatprep.subr.mxu0 %v3285_v0 }
 0x20f   :  { %2502 = vmatpush3.msra.mxu0 %v538_v38 }
 0x210   :  { %2503 = vmatprep.subr.mxu0 %v3285_v0 }
 0x211   :  { %2504 = vmatpush3.msra.mxu0 %v537_v39 }
 0x212   :  { %2505 = vmatprep.subr.mxu0 %v3285_v0 }
 0x213   :  { %2506 = vmatpush3.msra.mxu0 %v536_v40  ;;  %v623_v40 = vld [vmem:[#allocation11 + $0x8] sm:$0xff] }
 0x214   :  { %2507 = vmatprep.subr.mxu0 %v3285_v0 }
 0x215   :  { %2508 = vmatpush3.msra.mxu0 %v535_v41  ;;  %v622_v41 = vld [vmem:[#allocation11] sm:$0xff] }
 0x216   :  { %2509 = vmatprep.subr.mxu0 %v3285_v0 }
 0x217   :  { %2510 = vmatpush3.msra.mxu0 %v534_v42  ;;  %v729_v42 = vld [vmem:[#allocation13 + $0x78] sm:$0xff] }
 0x218   :  { %2511 = vmatprep.subr.mxu0 %v3285_v0 }
 0x219   :  { %2512 = vmatpush3.msra.mxu0 %v533_v43  ;;  %v728_v43 = vld [vmem:[#allocation13 + $0x70] sm:$0xff] }
 0x21a   :  { %2513 = vmatprep.subr.mxu0 %v3285_v0 }
 0x21b   :  { %2514 = vmatpush3.msra.mxu0 %v532_v44  ;;  %v727_v44 = vld [vmem:[#allocation13 + $0x68] sm:$0xff] }
 0x21c   :  { %2515 = vmatprep.subr.mxu0 %v3285_v0 }
 0x21d   :  { %2516 = vmatpush3.msra.mxu0 %v531_v50  ;;  %v721_v50 = vld [vmem:[#allocation13 + $0x38] sm:$0xff] }
 0x21e   :  { %2517 = vmatprep.subr.mxu0 %v3285_v0 }
 0x21f   :  { %2518 = vmatpush3.msra.mxu0 %v530_v51  ;;  %v720_v51 = vld [vmem:[#allocation13 + $0x30] sm:$0xff] }
 0x220   :  { %2519 = vmatprep.subr.mxu0 %v3285_v0 }
 0x221   :  { %2520 = vmatpush3.msra.mxu0 %v529_v52  ;;  %v719_v52 = vld [vmem:[#allocation13 + $0x28] sm:$0xff] }
 0x222   :  { %2559 = vmatprep.subr.mxu0 %v3285_v0 }
 0x2c2   :  { %v432_v46 = vpop.f32.mrf.mxu0 }
 0x2c3   :  { %v433_v47 = vadd.f32 %v2038_v45, %v432_v46  ;;  %v726_v45 = vld [vmem:[#allocation13 + $0x60] sm:$0xff]  ;;  %v725_v46 = vld [vmem:[#allocation13 + $0x58] sm:$0xff] }
 0x2c4   :  { %v2453_v48 = vpop.f32.mrf.mxu0 }
 0x2c5   :  { %v436_v49 = vmax.f32 %v433_v47, 0.0  ;;  %v724_v47 = vld [vmem:[#allocation13 + $0x50] sm:$0xff]  ;;  %v723_v48 = vld [vmem:[#allocation13 + $0x48] sm:$0xff] }
 0x2c7   :  { %2487 = vmatmul.mubr.f32.vlgmr.msra.gmra.mxu1 %v436_v49  ;;  %v722_v49 = vld [vmem:[#allocation13 + $0x40] sm:$0xff] }
 0x2c8   :  { %2556 = vmatprep.mubr.msk.f32.mxu1 %vm3286_vm0, %v3285_v0  ;;  %2525 = vmatpush3.msra.mxu1 %v637_v53  ;;  %v718_v53 = vld [vmem:[#allocation13 + $0x20] sm:$0xff] }
 0x2c9   :  { %2526 = vmatprep.subr.mxu1 %v3285_v0 }
 0x2ca   :  { %2527 = vmatpush3.msra.mxu1 %v636_v54  ;;  %v717_v54 = vld [vmem:[#allocation13 + $0x18] sm:$0xff] }
 0x2cb   :  { %2528 = vmatprep.subr.mxu1 %v3285_v0 }
 0x2cc   :  { %2529 = vmatpush3.msra.mxu1 %v635_v55  ;;  %v2040_v55 = vld [vmem:[%s4143_s12 + $0x4] ss:$0 sm:$0xff] }
 0x2cd   :  { %2530 = vmatprep.subr.mxu1 %v3285_v0 }
 0x2ce   :  { %2531 = vmatpush3.msra.mxu1 %v634_v56 }
 0x2cf   :  { %2532 = vmatprep.subr.mxu1 %v3285_v0 }
 0x2d0   :  { %2533 = vmatpush3.msra.mxu1 %v633_v57 }
 0x2d1   :  { %2534 = vmatprep.subr.mxu1 %v3285_v0 }
 0x2d2   :  { %2535 = vmatpush3.msra.mxu1 %v632_v58 }
 0x2d3   :  { %2536 = vmatprep.subr.mxu1 %v3285_v0 }
 0x2d4   :  { %2537 = vmatpush3.msra.mxu1 %v631_v59  ;;  %v716_v59 = vld [vmem:[#allocation13 + $0x10] sm:$0xff] }
 0x2d5   :  { %2538 = vmatprep.subr.mxu1 %v3285_v0 }
 0x2d6   :  { %2539 = vmatpush3.msra.mxu1 %v630_v60  ;;  %v715_v60 = vld [vmem:[#allocation13 + $0x8] sm:$0xff] }
 0x2d7   :  { %2540 = vmatprep.subr.mxu1 %v3285_v0 }
 0x2d8   :  { %2541 = vmatpush3.msra.mxu1 %v629_v61  ;;  %v714_v61 = vld [vmem:[#allocation13] sm:$0xff] }
 0x2d9   :  { %2542 = vmatprep.subr.mxu1 %v3285_v0 }
 0x2da   :  { %2543 = vmatpush3.msra.mxu1 %v628_v62  ;;  %v821_v62 = vld [vmem:[#allocation14 + $0x78] sm:$0xff] }
 0x2db   :  { %2544 = vmatprep.subr.mxu1 %v3285_v0 }
 0x2dc   :  { %2545 = vmatpush3.msra.mxu1 %v627_v63  ;;  %v820_v63 = vld [vmem:[#allocation14 + $0x70] sm:$0xff] }
 0x2dd   :  { %2546 = vmatprep.subr.mxu1 %v3285_v0 }
 0x2de   :  { %2547 = vmatpush3.msra.mxu1 %v626_v5  ;;  %v819_v5 = vld [vmem:[#allocation14 + $0x68] sm:$0xff] }
 0x2df   :  { %2548 = vmatprep.subr.mxu1 %v3285_v0 }
 0x2e0   :  { %2549 = vmatpush3.msra.mxu1 %v625_v32  ;;  %v818_v32 = vld [vmem:[#allocation14 + $0x60] sm:$0xff] }
 0x2e1   :  { %2550 = vmatprep.subr.mxu1 %v3285_v0 }
 0x2e2   :  { %2551 = vmatpush3.msra.mxu1 %v624_v33  ;;  %v817_v33 = vld [vmem:[#allocation14 + $0x58] sm:$0xff] }
 0x2e3   :  { %2552 = vmatprep.subr.mxu1 %v3285_v0 }
 0x2e4   :  { %2553 = vmatpush3.msra.mxu1 %v623_v40  ;;  %v811_v40 = vld [vmem:[#allocation14 + $0x28] sm:$0xff] }
 0x2e5   :  { %2554 = vmatprep.subr.mxu1 %v3285_v0 }
 0x2e6   :  { %2555 = vmatpush3.msra.mxu1 %v622_v41  ;;  %v810_v41 = vld [vmem:[#allocation14 + $0x20] sm:$0xff] }
 0x2e7   :  { %2594 = vmatprep.subr.mxu1 %v3285_v0 }
 0x387   :  { %v524_v36 = vpop.f32.mrf.mxu1 }
 0x388   :  { %v525_v37 = vadd.f32 %v2039_v34, %v524_v36  ;;  %v816_v34 = vld [vmem:[#allocation14 + $0x50] sm:$0xff]  ;;  %v815_v36 = vld [vmem:[#allocation14 + $0x48] sm:$0xff] }
 0x389   :  { %v2488_v38 = vpop.f32.mrf.mxu1 }
 0x38a   :  { %v528_v39 = vmax.f32 %v525_v37, 0.0  ;;  %v814_v37 = vld [vmem:[#allocation14 + $0x40] sm:$0xff]  ;;  %v813_v38 = vld [vmem:[#allocation14 + $0x38] sm:$0xff] }
 0x38c   :  { %2522 = vmatmul.mubr.f32.vlgmr.msra.gmra.mxu0 %v528_v39  ;;  %v812_v39 = vld [vmem:[#allocation14 + $0x30] sm:$0xff] }
 0x38d   :  { %2591 = vmatprep.mubr.msk.f32.mxu0 %vm3286_vm0, %v3285_v0  ;;  %2560 = vmatpush3.msra.mxu0 %v729_v42  ;;  %v809_v42 = vld [vmem:[#allocation14 + $0x18] sm:$0xff] }
 0x38e   :  { %2561 = vmatprep.subr.mxu0 %v3285_v0 }
 0x38f   :  { %2562 = vmatpush3.msra.mxu0 %v728_v43  ;;  %v2041_v43 = vld [vmem:[%s4143_s12 + $0x5] ss:$0 sm:$0xff] }
 0x390   :  { %2563 = vmatprep.subr.mxu0 %v3285_v0 }
 0x391   :  { %2564 = vmatpush3.msra.mxu0 %v727_v44 }
 0x392   :  { %2565 = vmatprep.subr.mxu0 %v3285_v0 }
 0x393   :  { %2566 = vmatpush3.msra.mxu0 %v726_v45 }
 0x394   :  { %2567 = vmatprep.subr.mxu0 %v3285_v0 }
 0x395   :  { %2568 = vmatpush3.msra.mxu0 %v725_v46 }
 0x396   :  { %2569 = vmatprep.subr.mxu0 %v3285_v0 }
 0x397   :  { %2570 = vmatpush3.msra.mxu0 %v724_v47 }
 0x398   :  { %2571 = vmatprep.subr.mxu0 %v3285_v0 }
 0x399   :  { %2572 = vmatpush3.msra.mxu0 %v723_v48  ;;  %v808_v48 = vld [vmem:[#allocation14 + $0x10] sm:$0xff] }
 0x39a   :  { %2573 = vmatprep.subr.mxu0 %v3285_v0 }
 0x39b   :  { %2574 = vmatpush3.msra.mxu0 %v722_v49  ;;  %v807_v49 = vld [vmem:[#allocation14 + $0x8] sm:$0xff] }
 0x39c   :  { %2575 = vmatprep.subr.mxu0 %v3285_v0 }
 0x39d   :  { %2576 = vmatpush3.msra.mxu0 %v721_v50  ;;  %v806_v50 = vld [vmem:[#allocation14] sm:$0xff] }
 0x39e   :  { %2577 = vmatprep.subr.mxu0 %v3285_v0 }
 0x39f   :  { %2578 = vmatpush3.msra.mxu0 %v720_v51  ;;  %v913_v51 = vld [vmem:[#allocation16 + $0x78] sm:$0xff] }
 0x3a0   :  { %2579 = vmatprep.subr.mxu0 %v3285_v0 }
 0x3a1   :  { %2580 = vmatpush3.msra.mxu0 %v719_v52  ;;  %v912_v52 = vld [vmem:[#allocation16 + $0x70] sm:$0xff] }
 0x3a2   :  { %2581 = vmatprep.subr.mxu0 %v3285_v0 }
 0x3a3   :  { %2582 = vmatpush3.msra.mxu0 %v718_v53  ;;  %v911_v53 = vld [vmem:[#allocation16 + $0x68] sm:$0xff] }
 0x3a4   :  { %2583 = vmatprep.subr.mxu0 %v3285_v0 }
 0x3a5   :  { %2584 = vmatpush3.msra.mxu0 %v717_v54  ;;  %v910_v54 = vld [vmem:[#allocation16 + $0x60] sm:$0xff] }
 0x3a6   :  { %2585 = vmatprep.subr.mxu0 %v3285_v0 }
 0x3a7   :  { %2586 = vmatpush3.msra.mxu0 %v716_v59  ;;  %v905_v59 = vld [vmem:[#allocation16 + $0x38] sm:$0xff] }
 0x3a8   :  { %2587 = vmatprep.subr.mxu0 %v3285_v0 }
 0x3a9   :  { %2588 = vmatpush3.msra.mxu0 %v715_v60  ;;  %v904_v60 = vld [vmem:[#allocation16 + $0x30] sm:$0xff] }
 0x3aa   :  { %2589 = vmatprep.subr.mxu0 %v3285_v0 }
 0x3ab   :  { %2590 = vmatpush3.msra.mxu0 %v714_v61  ;;  %v903_v61 = vld [vmem:[#allocation16 + $0x28] sm:$0xff] }
 0x3ac   :  { %2629 = vmatprep.subr.mxu0 %v3285_v0 }
 0x44c   :  { %v616_v56 = vpop.f32.mrf.mxu0 }
 0x44d   :  { %v617_v57 = vadd.f32 %v2040_v55, %v616_v56  ;;  %v909_v55 = vld [vmem:[#allocation16 + $0x58] sm:$0xff]  ;;  %v908_v56 = vld [vmem:[#allocation16 + $0x50] sm:$0xff] }
 0x44e   :  { %v2523_v58 = vpop.f32.mrf.mxu0 }
 0x44f   :  { %621 = vst.msk [vmem:[%s4144_s13] sm:$0xff] %vm620_vm2, %v617_v57  ;;  %2557 = vmatmul.mubr.f32.vlgmr.msra.gmra.mxu1 %v617_v57  ;;  %v907_v57 = vld [vmem:[#allocation16 + $0x48] sm:$0xff]  ;;  %v906_v58 = vld [vmem:[#allocation16 + $0x40] sm:$0xff] }
 0x450   :  { %2626 = vmatprep.mubr.msk.f32.mxu1 %vm3286_vm0, %v3285_v0  ;;  %2595 = vmatpush3.msra.mxu1 %v821_v62  ;;  %v902_v62 = vld [vmem:[#allocation16 + $0x20] sm:$0xff] }
 0x451   :  { %2596 = vmatprep.subr.mxu1 %v3285_v0 }
 0x452   :  { %2597 = vmatpush3.msra.mxu1 %v820_v63  ;;  %v901_v63 = vld [vmem:[#allocation16 + $0x18] sm:$0xff] }
 0x453   :  { %2598 = vmatprep.subr.mxu1 %v3285_v0 }
 0x454   :  { %2599 = vmatpush3.msra.mxu1 %v819_v5  ;;  %v900_v5 = vld [vmem:[#allocation16 + $0x10] sm:$0xff] }
 0x455   :  { %2600 = vmatprep.subr.mxu1 %v3285_v0 }
 0x456   :  { %2601 = vmatpush3.msra.mxu1 %v818_v32  ;;  %v2042_v32 = vld [vmem:[%s4143_s12 + $0x6] ss:$0 sm:$0xff] }
 0x457   :  { %2602 = vmatprep.subr.mxu1 %v3285_v0 }
 0x458   :  { %2603 = vmatpush3.msra.mxu1 %v817_v33 }
 0x459   :  { %2604 = vmatprep.subr.mxu1 %v3285_v0 }
 0x45a   :  { %2605 = vmatpush3.msra.mxu1 %v816_v34 }
 0x45b   :  { %2606 = vmatprep.subr.mxu1 %v3285_v0 }
 0x45c   :  { %2607 = vmatpush3.msra.mxu1 %v815_v36 }
 0x45d   :  { %2608 = vmatprep.subr.mxu1 %v3285_v0 }
 0x45e   :  { %2609 = vmatpush3.msra.mxu1 %v814_v37 }
 0x45f   :  { %2610 = vmatprep.subr.mxu1 %v3285_v0 }
 0x460   :  { %2611 = vmatpush3.msra.mxu1 %v813_v38  ;;  %v899_v38 = vld [vmem:[#allocation16 + $0x8] sm:$0xff] }
 0x461   :  { %2612 = vmatprep.subr.mxu1 %v3285_v0 }
 0x462   :  { %2613 = vmatpush3.msra.mxu1 %v812_v39  ;;  %v898_v39 = vld [vmem:[#allocation16] sm:$0xff] }
 0x463   :  { %2614 = vmatprep.subr.mxu1 %v3285_v0 }
 0x464   :  { %2615 = vmatpush3.msra.mxu1 %v811_v40  ;;  %v3758_v40 = vld [vmem:[%s4142_s11 + $0x78] sm:$0xff] }
 0x465   :  { %2616 = vmatprep.subr.mxu1 %v3285_v0 }
 0x466   :  { %2617 = vmatpush3.msra.mxu1 %v810_v41  ;;  %v3763_v41 = vld [vmem:[%s4142_s11 + $0x70] sm:$0xff] }
 0x467   :  { %2618 = vmatprep.subr.mxu1 %v3285_v0 }
 0x468   :  { %2619 = vmatpush3.msra.mxu1 %v809_v42  ;;  %v3770_v42 = vld [vmem:[%s4142_s11 + $0x68] sm:$0xff] }
 0x469   :  { %2620 = vmatprep.subr.mxu1 %v3285_v0 }
 0x46a   :  { %2621 = vmatpush3.msra.mxu1 %v808_v48  ;;  %v3812_v48 = vld [vmem:[%s4142_s11 + $0x38] sm:$0xff] }
 0x46b   :  { %2622 = vmatprep.subr.mxu1 %v3285_v0 }
 0x46c   :  { %2623 = vmatpush3.msra.mxu1 %v807_v49  ;;  %v3819_v49 = vld [vmem:[%s4142_s11 + $0x30] sm:$0xff] }
 0x46d   :  { %2624 = vmatprep.subr.mxu1 %v3285_v0 }
 0x46e   :  { %2625 = vmatpush3.msra.mxu1 %v806_v50  ;;  %v3826_v50 = vld [vmem:[%s4142_s11 + $0x28] sm:$0xff] }
 0x46f   :  { %2664 = vmatprep.subr.mxu1 %v3285_v0 }
 0x50f   :  { %v709_v44 = vpop.f32.mrf.mxu1 }
 0x510   :  { %v710_v45 = vadd.f32 %v2041_v43, %v709_v44  ;;  %v3777_v43 = vld [vmem:[%s4142_s11 + $0x60] sm:$0xff]  ;;  %v3784_v44 = vld [vmem:[%s4142_s11 + $0x58] sm:$0xff] }
 0x511   :  { %v2558_v46 = vpop.f32.mrf.mxu1 }
 0x512   :  { %v713_v47 = vmax.f32 %v710_v45, 0.0  ;;  %v3791_v45 = vld [vmem:[%s4142_s11 + $0x50] sm:$0xff]  ;;  %v3798_v46 = vld [vmem:[%s4142_s11 + $0x48] sm:$0xff] }
 0x514   :  { %2592 = vmatmul.mubr.f32.vlgmr.msra.gmra.mxu0 %v713_v47  ;;  %v3805_v47 = vld [vmem:[%s4142_s11 + $0x40] sm:$0xff] }
 0x515   :  { %2661 = vmatprep.mubr.msk.f32.mxu0 %vm3286_vm0, %v3285_v0  ;;  %2630 = vmatpush3.msra.mxu0 %v913_v51  ;;  %v3833_v51 = vld [vmem:[%s4142_s11 + $0x20] sm:$0xff] }
 0x516   :  { %2631 = vmatprep.subr.mxu0 %v3285_v0 }
 0x517   :  { %2632 = vmatpush3.msra.mxu0 %v912_v52  ;;  %v3840_v52 = vld [vmem:[%s4142_s11 + $0x18] sm:$0xff] }
 0x518   :  { %2633 = vmatprep.subr.mxu0 %v3285_v0 }
 0x519   :  { %2634 = vmatpush3.msra.mxu0 %v911_v53  ;;  %v2043_v53 = vld [vmem:[%s4143_s12 + $0x7] ss:$0 sm:$0xff] }
 0x51a   :  { %2635 = vmatprep.subr.mxu0 %v3285_v0 }
 0x51b   :  { %2636 = vmatpush3.msra.mxu0 %v910_v54 }
 0x51c   :  { %2637 = vmatprep.subr.mxu0 %v3285_v0 }
 0x51d   :  { %2638 = vmatpush3.msra.mxu0 %v909_v55 }
 0x51e   :  { %2639 = vmatprep.subr.mxu0 %v3285_v0 }
 0x51f   :  { %2640 = vmatpush3.msra.mxu0 %v908_v56 }
 0x520   :  { %2641 = vmatprep.subr.mxu0 %v3285_v0 }
 0x521   :  { %2642 = vmatpush3.msra.mxu0 %v907_v57 }
 0x522   :  { %2643 = vmatprep.subr.mxu0 %v3285_v0 }
 0x523   :  { %2644 = vmatpush3.msra.mxu0 %v906_v58  ;;  %v1082_v58 = vld [vmem:[#allocation5] sm:$0xff] }
 0x524   :  { %2645 = vmatprep.subr.mxu0 %v3285_v0 }
 0x525   :  { %2646 = vmatpush3.msra.mxu0 %v905_v59  ;;  %v3968_v59 = vld [vmem:[%s4143_s12 + $0x9] ss:$0 sm:$0xff] }
 0x526   :  { %2647 = vmatprep.subr.mxu0 %v3285_v0 }
 0x527   :  { %2648 = vmatpush3.msra.mxu0 %v904_v60 }
 0x528   :  { %2649 = vmatprep.subr.mxu0 %v3285_v0 }
 0x529   :  { %2650 = vmatpush3.msra.mxu0 %v903_v61 }
 0x52a   :  { %2651 = vmatprep.subr.mxu0 %v3285_v0 }
 0x52b   :  { %2652 = vmatpush3.msra.mxu0 %v902_v62 }
 0x52c   :  { %2653 = vmatprep.subr.mxu0 %v3285_v0 }
 0x52d   :  { %2654 = vmatpush3.msra.mxu0 %v901_v63  ;;  %v2048_v63 = vld [vmem:[%s4143_s12 + $0x1] ss:$0 sm:$0xff] }
 0x52e   :  { %2655 = vmatprep.subr.mxu0 %v3285_v0 }
 0x52f   :  { %2656 = vmatpush3.msra.mxu0 %v900_v5 }
 0x530   :  { %2657 = vmatprep.subr.mxu0 %v3285_v0 }
 0x531   :  { %2658 = vmatpush3.msra.mxu0 %v899_v38  ;;  %v1350_v38 = vld [vmem:[#allocation8] sm:$0xff] }
 0x532   :  { %2659 = vmatprep.subr.mxu0 %v3285_v0 }
 0x533   :  { %2660 = vmatpush3.msra.mxu0 %v898_v39  ;;  %v1457_v39 = vld [vmem:[#allocation10 + $0x78] sm:$0xff] }
 0x534   :  { %2699 = vmatprep.subr.mxu0 %v3285_v0 }
 0x5d4   :  { %v801_v33 = vpop.f32.mrf.mxu0 }
 0x5d5   :  { %v802_v34 = vadd.f32 %v2042_v32, %v801_v33 }
 0x5d6   :  { %v2593_v36 = vpop.f32.mrf.mxu0 }
 0x5d7   :  { %v805_v37 = vmax.f32 %v802_v34, 0.0  ;;  %v1352_v36 = vld [vmem:[#allocation8 + $0x10] sm:$0xff] }
 0x5d9   :  { %2627 = vmatmul.mubr.f32.vlgmr.msra.gmra.mxu1 %v805_v37  ;;  %v1351_v37 = vld [vmem:[#allocation8 + $0x8] sm:$0xff] }
 0x5da   :  { %2696 = vmatprep.mubr.msk.f32.mxu1 %vm3286_vm0, %v3285_v0  ;;  %2665 = vmatpush3.msra.mxu1 %v3758_v40 }
 0x5db   :  { %2666 = vmatprep.subr.mxu1 %v3285_v0 }
 0x5dc   :  { %2667 = vmatpush3.msra.mxu1 %v3763_v41 }
 0x5dd   :  { %2668 = vmatprep.subr.mxu1 %v3285_v0 }
 0x5de   :  { %2669 = vmatpush3.msra.mxu1 %v3770_v42 }
 0x5df   :  { %2670 = vmatprep.subr.mxu1 %v3285_v0 }
 0x5e0   :  { %2671 = vmatpush3.msra.mxu1 %v3777_v43 }
 0x5e1   :  { %2672 = vmatprep.subr.mxu1 %v3285_v0 }
 0x5e2   :  { %2673 = vmatpush3.msra.mxu1 %v3784_v44 }
 0x5e3   :  { %2674 = vmatprep.subr.mxu1 %v3285_v0 }
 0x5e4   :  { %2675 = vmatpush3.msra.mxu1 %v3791_v45 }
 0x5e5   :  { %2676 = vmatprep.subr.mxu1 %v3285_v0 }
 0x5e6   :  { %2677 = vmatpush3.msra.mxu1 %v3798_v46 }
 0x5e7   :  { %2678 = vmatprep.subr.mxu1 %v3285_v0 }
 0x5e8   :  { %2679 = vmatpush3.msra.mxu1 %v3805_v47 }
 0x5e9   :  { %2680 = vmatprep.subr.mxu1 %v3285_v0 }
 0x5ea   :  { %2681 = vmatpush3.msra.mxu1 %v3812_v48 }
 0x5eb   :  { %2682 = vmatprep.subr.mxu1 %v3285_v0 }
 0x5ec   :  { %2683 = vmatpush3.msra.mxu1 %v3819_v49 }
 0x5ed   :  { %2684 = vmatprep.subr.mxu1 %v3285_v0 }
 0x5ee   :  { %2685 = vmatpush3.msra.mxu1 %v3826_v50 }
 0x5ef   :  { %2686 = vmatprep.subr.mxu1 %v3285_v0 }
 0x5f0   :  { %2687 = vmatpush3.msra.mxu1 %v3833_v51 }
 0x5f1   :  { %2688 = vmatprep.subr.mxu1 %v3285_v0 }
 0x5f2   :  { %2689 = vmatpush3.msra.mxu1 %v3840_v52 }
 0x5f3   :  { %2690 = vmatprep.subr.mxu1 %v3285_v0 }
 0x699   :  { %v893_v54 = vpop.f32.mrf.mxu1 }
 0x69a   :  { %v894_v55 = vadd.f32 %v2043_v53, %v893_v54  ;;  %v1456_v53 = vld [vmem:[#allocation10 + $0x70] sm:$0xff]  ;;  %v1455_v54 = vld [vmem:[#allocation10 + $0x68] sm:$0xff] }
 0x69b   :  { %v2628_v56 = vpop.f32.mrf.mxu1 }
 0x69c   :  { %v897_v57 = vmax.f32 %v894_v55, 0.0  ;;  %v1454_v55 = vld [vmem:[#allocation10 + $0x60] sm:$0xff]  ;;  %v1453_v56 = vld [vmem:[#allocation10 + $0x58] sm:$0xff] }
 0x69e   :  { %2662 = vmatmul.mubr.f32.vlgmr.msra.gmra.mxu0 %v897_v57  ;;  %v1452_v57 = vld [vmem:[#allocation10 + $0x50] sm:$0xff] }
 0x69f   :  { %2700 = vmatpush3.msra.mxu0 %v3431_v1  ;;  %2707 = vmatprep.mubr.msk.f32.mxu0 %vm3286_vm0, %v3285_v0  ;;  %v3897_v1 = vld [vmem:[%s4142_s11 + $0x10] sm:$0xff] }
 0x6a0   :  { %2701 = vmatprep.subr.mxu0 %v3285_v0  ;;  %2691 = vmatpush3.msra.mxu1 %v3897_v1 }
 0x6a1   :  { %2702 = vmatpush3.msra.mxu0 %v3436_v2  ;;  %2692 = vmatprep.subr.mxu1 %v3285_v0  ;;  %v3904_v2 = vld [vmem:[%s4142_s11 + $0x8] sm:$0xff] }
 0x6a2   :  { %2703 = vmatprep.subr.mxu0 %v3285_v0  ;;  %2693 = vmatpush3.msra.mxu1 %v3904_v2 }
 0x6a3   :  { %2704 = vmatpush3.msra.mxu0 %v3443_v3  ;;  %v3910_v3 = vld [vmem:[%s4142_s11] sm:$0xff]  ;;  %2694 = vmatprep.subr.mxu1 %v3285_v0 }
 0x6a4   :  { %2705 = vmatprep.subr.mxu0 %v3285_v0  ;;  %2695 = vmatpush3.msra.mxu1 %v3910_v3 }
 0x6a5   :  { %2706 = vmatpush3.msra.mxu0 %v3450_v4  ;;  %2745 = vmatprep.subr.mxu1 %v3285_v0  ;;  %v3918_v4 = vld [vmem:[%s4143_s12 + $0x8] ss:$0 sm:$0xff] }
 0x6a6   :  { %2708 = vmatmul.mubr.msk.f32.vlgmr.msra.gmra.mxu0 %vm178_vm1, %v1082_v58  ;;  %2710 = vmatprep.subr.mxu0 %v3285_v0  ;;  %v1451_v58 = vld [vmem:[#allocation10 + $0x48] sm:$0xff] }
 0x6a7   :  { %2711 = vmatpush3.msra.mxu0 %v3457_v6  ;;  %2742 = vmatprep.mubr.msk.f32.mxu0 %vm3286_vm0, %v3285_v0 }
 0x6a8   :  { %2712 = vmatprep.subr.mxu0 %v3285_v0 }
 0x6a9   :  { %2713 = vmatpush3.msra.mxu0 %v3465_v7 }
 0x6aa   :  { %2714 = vmatprep.subr.mxu0 %v3285_v0 }
 0x6ab   :  { %2715 = vmatpush3.msra.mxu0 %v3474_v8 }
 0x6ac   :  { %2716 = vmatprep.subr.mxu0 %v3285_v0 }
 0x6ad   :  { %2717 = vmatpush3.msra.mxu0 %v3481_v9 }
 0x6ae   :  { %2718 = vmatprep.subr.mxu0 %v3285_v0 }
 0x6af   :  { %2719 = vmatpush3.msra.mxu0 %v3488_v10 }
 0x6b0   :  { %2720 = vmatprep.subr.mxu0 %v3285_v0 }
 0x6b1   :  { %2721 = vmatpush3.msra.mxu0 %v3495_v11 }
 0x6b2   :  { %2722 = vmatprep.subr.mxu0 %v3285_v0 }
 0x6b3   :  { %2723 = vmatpush3.msra.mxu0 %v3502_v12 }
 0x6b4   :  { %2724 = vmatprep.subr.mxu0 %v3285_v0 }
 0x6b5   :  { %2725 = vmatpush3.msra.mxu0 %v3509_v13 }
 0x6b6   :  { %2726 = vmatprep.subr.mxu0 %v3285_v0 }
 0x6b7   :  { %2727 = vmatpush3.msra.mxu0 %v3516_v14  ;;  %v1263_v14 = vld [vmem:[#allocation7 + $0x28] sm:$0xff] }
 0x6b8   :  { %2728 = vmatprep.subr.mxu0 %v3285_v0 }
 0x6b9   :  { %2729 = vmatpush3.msra.mxu0 %v3523_v15  ;;  %v1262_v15 = vld [vmem:[#allocation7 + $0x20] sm:$0xff] }
 0x6ba   :  { %2730 = vmatprep.subr.mxu0 %v3285_v0 }
 0x6bb   :  { %2731 = vmatpush3.msra.mxu0 %v3530_v16  ;;  %v1261_v16 = vld [vmem:[#allocation7 + $0x18] sm:$0xff] }
 0x6bc   :  { %2732 = vmatprep.subr.mxu0 %v3285_v0 }
 0x6bd   :  { %2733 = vmatpush3.msra.mxu0 %v3537_v17  ;;  %v1260_v17 = vld [vmem:[#allocation7 + $0x10] sm:$0xff] }
 0x6be   :  { %2734 = vmatprep.subr.mxu0 %v3285_v0 }
 0x6bf   :  { %2735 = vmatpush3.msra.mxu0 %v3544_v18  ;;  %v1259_v18 = vld [vmem:[#allocation7 + $0x8] sm:$0xff] }
 0x6c0   :  { %2736 = vmatprep.subr.mxu0 %v3285_v0 }
 0x6c1   :  { %2737 = vmatpush3.msra.mxu0 %v3553_v19  ;;  %v1258_v19 = vld [vmem:[#allocation7] sm:$0xff] }
 0x6c2   :  { %2738 = vmatprep.subr.mxu0 %v3285_v0 }
 0x6c3   :  { %2739 = vmatpush3.msra.mxu0 %v3560_v20  ;;  %v1365_v20 = vld [vmem:[#allocation8 + $0x78] sm:$0xff] }
 0x6c4   :  { %2740 = vmatprep.subr.mxu0 %v3285_v0 }
 0x6c5   :  { %2741 = vmatpush3.msra.mxu0 %v3567_v21  ;;  %v1364_v21 = vld [vmem:[#allocation8 + $0x70] sm:$0xff] }
 0x6c6   :  { %2780 = vmatprep.subr.mxu0 %v3285_v0 }
 0x75e   :  { %v985_v6 = vpop.f32.mrf.mxu0 }
 0x75f   :  { %v986_v7 = vadd.f32 %v3918_v4, %v985_v6  ;;  %v1450_v6 = vld [vmem:[#allocation10 + $0x40] sm:$0xff] }
 0x760   :  { %v2663_v8 = vpop.f32.mrf.mxu0 }
 0x761   :  { %v989_v9 = vmax.f32 %v986_v7, 0.0  ;;  %v1449_v7 = vld [vmem:[#allocation10 + $0x38] sm:$0xff]  ;;  %v1448_v8 = vld [vmem:[#allocation10 + $0x30] sm:$0xff] }
 0x763   :  { %2697 = vmatmul.mubr.f32.vlgmr.msra.gmra.mxu1 %v989_v9  ;;  %v1447_v9 = vld [vmem:[#allocation10 + $0x28] sm:$0xff] }
 0x764   :  { %2746 = vmatpush3.msra.mxu1 %v3570_v22  ;;  %2777 = vmatprep.mubr.msk.f32.mxu1 %vm3286_vm0, %v3285_v0  ;;  %v1363_v22 = vld [vmem:[#allocation8 + $0x68] sm:$0xff] }
 0x765   :  { %2747 = vmatprep.subr.mxu1 %v3285_v0 }
 0x766   :  { %v1161_v10 = vpop.f32.mrf.mxu0  ;;  %2748 = vmatpush3.msra.mxu1 %v3572_v23  ;;  %v1362_v23 = vld [vmem:[#allocation8 + $0x60] sm:$0xff] }
 0x767   :  { %v1162_v11 = vadd.f32 %v3617_v35, %v1161_v10  ;;  %2749 = vmatprep.subr.mxu1 %v3285_v0  ;;  %v1353_v35 = vld [vmem:[#allocation8 + $0x18] sm:$0xff]  ;;  %v1446_v10 = vld [vmem:[#allocation10 + $0x20] sm:$0xff] }
 0x768   :  { %v2709_v12 = vpop.f32.mrf.mxu0  ;;  %2750 = vmatpush3.msra.mxu1 %v3577_v24  ;;  %v1361_v24 = vld [vmem:[#allocation8 + $0x58] sm:$0xff] }
 0x769   :  { %v1165_v13 = vmax.f32 %v1162_v11, 0.0  ;;  %2751 = vmatprep.subr.mxu1 %v3285_v0  ;;  %v1445_v11 = vld [vmem:[#allocation10 + $0x18] sm:$0xff]  ;;  %v2049_v12 = vld [vmem:[%s4143_s12 + $0x2] ss:$0 sm:$0xff] }
 0x76a   :  { %2752 = vmatpush3.msra.mxu1 %v3581_v25  ;;  %v1360_v25 = vld [vmem:[#allocation8 + $0x50] sm:$0xff] }
 0x76b   :  { %2743 = vmatmul.mubr.f32.vlgmr.msra.gmra.mxu0 %v1165_v13  ;;  %2753 = vmatprep.subr.mxu1 %v3285_v0 }
 0x76c   :  { %2754 = vmatpush3.msra.mxu1 %v3585_v26  ;;  %2812 = vmatprep.mubr.msk.f32.mxu0 %vm3286_vm0, %v3285_v0  ;;  %v1359_v26 = vld [vmem:[#allocation8 + $0x48] sm:$0xff] }
 0x76d   :  { %2755 = vmatprep.subr.mxu1 %v3285_v0  ;;  %2781 = vmatpush3.msra.mxu0 %v1365_v20  ;;  %v1549_v20 = vld [vmem:[#allocation11 + $0x78] sm:$0xff] }
 0x76e   :  { %2756 = vmatpush3.msra.mxu1 %v3589_v27  ;;  %2782 = vmatprep.subr.mxu0 %v3285_v0  ;;  %v1358_v27 = vld [vmem:[#allocation8 + $0x40] sm:$0xff] }
 0x76f   :  { %2757 = vmatprep.subr.mxu1 %v3285_v0  ;;  %2783 = vmatpush3.msra.mxu0 %v1364_v21  ;;  %v1548_v21 = vld [vmem:[#allocation11 + $0x70] sm:$0xff] }
 0x770   :  { %2758 = vmatpush3.msra.mxu1 %v3593_v28  ;;  %2784 = vmatprep.subr.mxu0 %v3285_v0  ;;  %v1357_v28 = vld [vmem:[#allocation8 + $0x38] sm:$0xff] }
 0x771   :  { %2759 = vmatprep.subr.mxu1 %v3285_v0  ;;  %2785 = vmatpush3.msra.mxu0 %v1363_v22  ;;  %v1547_v22 = vld [vmem:[#allocation11 + $0x68] sm:$0xff] }
 0x772   :  { %2760 = vmatpush3.msra.mxu1 %v3597_v29  ;;  %2786 = vmatprep.subr.mxu0 %v3285_v0  ;;  %v1356_v29 = vld [vmem:[#allocation8 + $0x30] sm:$0xff] }
 0x773   :  { %2761 = vmatprep.subr.mxu1 %v3285_v0  ;;  %2787 = vmatpush3.msra.mxu0 %v1362_v23  ;;  %v1546_v23 = vld [vmem:[#allocation11 + $0x60] sm:$0xff] }
 0x774   :  { %2762 = vmatpush3.msra.mxu1 %v3601_v30  ;;  %2788 = vmatprep.subr.mxu0 %v3285_v0  ;;  %v1355_v30 = vld [vmem:[#allocation8 + $0x28] sm:$0xff] }
 0x775   :  { %2763 = vmatprep.subr.mxu1 %v3285_v0  ;;  %2789 = vmatpush3.msra.mxu0 %v1361_v24  ;;  %v1545_v24 = vld [vmem:[#allocation11 + $0x58] sm:$0xff] }
 0x776   :  { %2764 = vmatpush3.msra.mxu1 %v3605_v31  ;;  %2790 = vmatprep.subr.mxu0 %v3285_v0  ;;  %v1354_v31 = vld [vmem:[#allocation8 + $0x20] sm:$0xff] }
 0x777   :  { %2765 = vmatprep.subr.mxu1 %v3285_v0  ;;  %2791 = vmatpush3.msra.mxu0 %v1360_v25  ;;  %v1544_v25 = vld [vmem:[#allocation11 + $0x50] sm:$0xff] }
 0x778   :  { %2766 = vmatpush3.msra.mxu1 %v1263_v14  ;;  %2792 = vmatprep.subr.mxu0 %v3285_v0 }
 0x779   :  { %2767 = vmatprep.subr.mxu1 %v3285_v0  ;;  %2793 = vmatpush3.msra.mxu0 %v1359_v26  ;;  %v1543_v26 = vld [vmem:[#allocation11 + $0x48] sm:$0xff] }
 0x77a   :  { %2768 = vmatpush3.msra.mxu1 %v1262_v15  ;;  %2794 = vmatprep.subr.mxu0 %v3285_v0 }
 0x77b   :  { %2769 = vmatprep.subr.mxu1 %v3285_v0  ;;  %2795 = vmatpush3.msra.mxu0 %v1358_v27  ;;  %v1542_v27 = vld [vmem:[#allocation11 + $0x40] sm:$0xff] }
 0x77c   :  { %2770 = vmatpush3.msra.mxu1 %v1261_v16  ;;  %2796 = vmatprep.subr.mxu0 %v3285_v0 }
 0x77d   :  { %2771 = vmatprep.subr.mxu1 %v3285_v0  ;;  %2797 = vmatpush3.msra.mxu0 %v1357_v28  ;;  %v1541_v28 = vld [vmem:[#allocation11 + $0x38] sm:$0xff] }
 0x77e   :  { %2772 = vmatpush3.msra.mxu1 %v1260_v17  ;;  %2798 = vmatprep.subr.mxu0 %v3285_v0  ;;  %v1444_v17 = vld [vmem:[#allocation10 + $0x10] sm:$0xff] }
 0x77f   :  { %2773 = vmatprep.subr.mxu1 %v3285_v0  ;;  %2799 = vmatpush3.msra.mxu0 %v1356_v29  ;;  %v1540_v29 = vld [vmem:[#allocation11 + $0x30] sm:$0xff] }
 0x780   :  { %2774 = vmatpush3.msra.mxu1 %v1259_v18  ;;  %2800 = vmatprep.subr.mxu0 %v3285_v0  ;;  %v1443_v18 = vld [vmem:[#allocation10 + $0x8] sm:$0xff] }
 0x781   :  { %2775 = vmatprep.subr.mxu1 %v3285_v0  ;;  %2801 = vmatpush3.msra.mxu0 %v1355_v30  ;;  %v1539_v30 = vld [vmem:[#allocation11 + $0x28] sm:$0xff] }
 0x782   :  { %2776 = vmatpush3.msra.mxu1 %v1258_v19  ;;  %2802 = vmatprep.subr.mxu0 %v3285_v0  ;;  %v1442_v19 = vld [vmem:[#allocation10] sm:$0xff] }
 0x783   :  { %2815 = vmatprep.subr.mxu1 %v3285_v0  ;;  %2803 = vmatpush3.msra.mxu0 %v1354_v31  ;;  %v1538_v31 = vld [vmem:[#allocation11 + $0x20] sm:$0xff] }
 0x784   :  { %2804 = vmatprep.subr.mxu0 %v3285_v0 }
 0x785   :  { %2805 = vmatpush3.msra.mxu0 %v1353_v35  ;;  %v1537_v35 = vld [vmem:[#allocation11 + $0x18] sm:$0xff] }
 0x786   :  { %2806 = vmatprep.subr.mxu0 %v3285_v0 }
 0x787   :  { %2807 = vmatpush3.msra.mxu0 %v1352_v36  ;;  %v1641_v36 = vld [vmem:[#allocation13 + $0x78] sm:$0xff] }
 0x788   :  { %2808 = vmatprep.subr.mxu0 %v3285_v0 }
 0x789   :  { %2809 = vmatpush3.msra.mxu0 %v1351_v37  ;;  %v1640_v37 = vld [vmem:[#allocation13 + $0x70] sm:$0xff] }
 0x78a   :  { %2810 = vmatprep.subr.mxu0 %v3285_v0 }
 0x78b   :  { %2811 = vmatpush3.msra.mxu0 %v1350_v38  ;;  %v1639_v38 = vld [vmem:[#allocation13 + $0x68] sm:$0xff] }
 0x78c   :  { %2850 = vmatprep.subr.mxu0 %v3285_v0 }
 0x823   :  { %v1077_v60 = vpop.f32.mrf.mxu1 }
 0x824   :  { %v1078_v61 = vadd.f32 %v3968_v59, %v1077_v60  ;;  %v1536_v60 = vld [vmem:[#allocation11 + $0x10] sm:$0xff] }
 0x825   :  { %v2698_v62 = vpop.f32.mrf.mxu1 }
 0x826   :  { %1081 = vst.msk [vmem:[#allocation17] sm:$0xff] %vm178_vm1, %v1078_v61  ;;  %v2050_v61 = vld [vmem:[%s4143_s12 + $0x3] ss:$0 sm:$0xff] }
 0x82b   :  { %v1253_v5 = vpop.f32.mrf.mxu0 }
 0x82c   :  { %v1254_v32 = vadd.f32 %v2048_v63, %v1253_v5 }
 0x82d   :  { %v2744_v33 = vpop.f32.mrf.mxu0 }
 0x82e   :  { %v1257_v34 = vmax.f32 %v1254_v32, 0.0  ;;  %v1535_v33 = vld [vmem:[#allocation11 + $0x8] sm:$0xff] }
 0x830   :  { %2778 = vmatmul.mubr.f32.vlgmr.msra.gmra.mxu1 %v1257_v34  ;;  %v1534_v34 = vld [vmem:[#allocation11] sm:$0xff] }
 0x831   :  { %2847 = vmatprep.mubr.msk.f32.mxu1 %vm3286_vm0, %v3285_v0  ;;  %2816 = vmatpush3.msra.mxu1 %v1457_v39  ;;  %v1638_v39 = vld [vmem:[#allocation13 + $0x60] sm:$0xff] }
 0x832   :  { %2817 = vmatprep.subr.mxu1 %v3285_v0 }
 0x833   :  { %2818 = vmatpush3.msra.mxu1 %v1456_v53  ;;  %v1637_v53 = vld [vmem:[#allocation13 + $0x58] sm:$0xff] }
 0x834   :  { %2819 = vmatprep.subr.mxu1 %v3285_v0 }
 0x835   :  { %2820 = vmatpush3.msra.mxu1 %v1455_v54  ;;  %v1636_v54 = vld [vmem:[#allocation13 + $0x50] sm:$0xff] }
 0x836   :  { %2821 = vmatprep.subr.mxu1 %v3285_v0 }
 0x837   :  { %2822 = vmatpush3.msra.mxu1 %v1454_v55  ;;  %v1635_v55 = vld [vmem:[#allocation13 + $0x48] sm:$0xff] }
 0x838   :  { %2823 = vmatprep.subr.mxu1 %v3285_v0 }
 0x839   :  { %2824 = vmatpush3.msra.mxu1 %v1453_v56  ;;  %v1634_v56 = vld [vmem:[#allocation13 + $0x40] sm:$0xff] }
 0x83a   :  { %2825 = vmatprep.subr.mxu1 %v3285_v0 }
 0x83b   :  { %2826 = vmatpush3.msra.mxu1 %v1452_v57  ;;  %v1633_v57 = vld [vmem:[#allocation13 + $0x38] sm:$0xff] }
 0x83c   :  { %2827 = vmatprep.subr.mxu1 %v3285_v0 }
 0x83d   :  { %2828 = vmatpush3.msra.mxu1 %v1451_v58  ;;  %v1632_v58 = vld [vmem:[#allocation13 + $0x30] sm:$0xff] }
 0x83e   :  { %2829 = vmatprep.subr.mxu1 %v3285_v0 }
 0x83f   :  { %2830 = vmatpush3.msra.mxu1 %v1450_v6  ;;  %v1631_v6 = vld [vmem:[#allocation13 + $0x28] sm:$0xff] }
 0x840   :  { %2831 = vmatprep.subr.mxu1 %v3285_v0 }
 0x841   :  { %2832 = vmatpush3.msra.mxu1 %v1449_v7  ;;  %v1630_v7 = vld [vmem:[#allocation13 + $0x20] sm:$0xff] }
 0x842   :  { %2833 = vmatprep.subr.mxu1 %v3285_v0 }
 0x843   :  { %2834 = vmatpush3.msra.mxu1 %v1448_v8  ;;  %v1629_v8 = vld [vmem:[#allocation13 + $0x18] sm:$0xff] }
 0x844   :  { %2835 = vmatprep.subr.mxu1 %v3285_v0 }
 0x845   :  { %2836 = vmatpush3.msra.mxu1 %v1447_v9  ;;  %v2051_v9 = vld [vmem:[%s4143_s12 + $0x4] ss:$0 sm:$0xff] }
 0x846   :  { %2837 = vmatprep.subr.mxu1 %v3285_v0 }
 0x847   :  { %2838 = vmatpush3.msra.mxu1 %v1446_v10 }
 0x848   :  { %2839 = vmatprep.subr.mxu1 %v3285_v0 }
 0x849   :  { %2840 = vmatpush3.msra.mxu1 %v1445_v11 }
 0x84a   :  { %2841 = vmatprep.subr.mxu1 %v3285_v0 }
 0x84b   :  { %2842 = vmatpush3.msra.mxu1 %v1444_v17  ;;  %v1732_v17 = vld [vmem:[#allocation14 + $0x70] sm:$0xff] }
 0x84c   :  { %2843 = vmatprep.subr.mxu1 %v3285_v0 }
 0x84d   :  { %2844 = vmatpush3.msra.mxu1 %v1443_v18  ;;  %v1731_v18 = vld [vmem:[#allocation14 + $0x68] sm:$0xff] }
 0x84e   :  { %2845 = vmatprep.subr.mxu1 %v3285_v0 }
 0x84f   :  { %2846 = vmatpush3.msra.mxu1 %v1442_v19  ;;  %v1730_v19 = vld [vmem:[#allocation14 + $0x60] sm:$0xff] }
 0x850   :  { %2885 = vmatprep.subr.mxu1 %v3285_v0 }
 0x8f0   :  { %v1345_v13 = vpop.f32.mrf.mxu1 }
 0x8f1   :  { %v1346_v14 = vadd.f32 %v2049_v12, %v1345_v13  ;;  %v1628_v13 = vld [vmem:[#allocation13 + $0x10] sm:$0xff] }
 0x8f2   :  { %v2779_v15 = vpop.f32.mrf.mxu1 }
 0x8f3   :  { %v1349_v16 = vmax.f32 %v1346_v14, 0.0  ;;  %v1627_v14 = vld [vmem:[#allocation13 + $0x8] sm:$0xff]  ;;  %v1626_v15 = vld [vmem:[#allocation13] sm:$0xff] }
 0x8f5   :  { %2813 = vmatmul.mubr.f32.vlgmr.msra.gmra.mxu0 %v1349_v16  ;;  %v1733_v16 = vld [vmem:[#allocation14 + $0x78] sm:$0xff] }
 0x8f6   :  { %2882 = vmatprep.mubr.msk.f32.mxu0 %vm3286_vm0, %v3285_v0  ;;  %2851 = vmatpush3.msra.mxu0 %v1549_v20  ;;  %v1729_v20 = vld [vmem:[#allocation14 + $0x58] sm:$0xff] }
 0x8f7   :  { %2852 = vmatprep.subr.mxu0 %v3285_v0 }
 0x8f8   :  { %2853 = vmatpush3.msra.mxu0 %v1548_v21  ;;  %v1728_v21 = vld [vmem:[#allocation14 + $0x50] sm:$0xff] }
 0x8f9   :  { %2854 = vmatprep.subr.mxu0 %v3285_v0 }
 0x8fa   :  { %2855 = vmatpush3.msra.mxu0 %v1547_v22  ;;  %v1727_v22 = vld [vmem:[#allocation14 + $0x48] sm:$0xff] }
 0x8fb   :  { %2856 = vmatprep.subr.mxu0 %v3285_v0 }
 0x8fc   :  { %2857 = vmatpush3.msra.mxu0 %v1546_v23  ;;  %v1726_v23 = vld [vmem:[#allocation14 + $0x40] sm:$0xff] }
 0x8fd   :  { %2858 = vmatprep.subr.mxu0 %v3285_v0 }
 0x8fe   :  { %2859 = vmatpush3.msra.mxu0 %v1545_v24  ;;  %v1725_v24 = vld [vmem:[#allocation14 + $0x38] sm:$0xff] }
 0x8ff   :  { %2860 = vmatprep.subr.mxu0 %v3285_v0 }
 0x900   :  { %2861 = vmatpush3.msra.mxu0 %v1544_v25  ;;  %v1724_v25 = vld [vmem:[#allocation14 + $0x30] sm:$0xff] }
 0x901   :  { %2862 = vmatprep.subr.mxu0 %v3285_v0 }
 0x902   :  { %2863 = vmatpush3.msra.mxu0 %v1543_v26  ;;  %v1723_v26 = vld [vmem:[#allocation14 + $0x28] sm:$0xff] }
 0x903   :  { %2864 = vmatprep.subr.mxu0 %v3285_v0 }
 0x904   :  { %2865 = vmatpush3.msra.mxu0 %v1542_v27  ;;  %v1722_v27 = vld [vmem:[#allocation14 + $0x20] sm:$0xff] }
 0x905   :  { %2866 = vmatprep.subr.mxu0 %v3285_v0 }
 0x906   :  { %2867 = vmatpush3.msra.mxu0 %v1541_v28  ;;  %v1721_v28 = vld [vmem:[#allocation14 + $0x18] sm:$0xff] }
 0x907   :  { %2868 = vmatprep.subr.mxu0 %v3285_v0 }
 0x908   :  { %2869 = vmatpush3.msra.mxu0 %v1540_v29  ;;  %v2052_v29 = vld [vmem:[%s4143_s12 + $0x5] ss:$0 sm:$0xff] }
 0x909   :  { %2870 = vmatprep.subr.mxu0 %v3285_v0 }
 0x90a   :  { %2871 = vmatpush3.msra.mxu0 %v1539_v30 }
 0x90b   :  { %2872 = vmatprep.subr.mxu0 %v3285_v0 }
 0x90c   :  { %2873 = vmatpush3.msra.mxu0 %v1538_v31 }
 0x90d   :  { %2874 = vmatprep.subr.mxu0 %v3285_v0 }
 0x90e   :  { %2875 = vmatpush3.msra.mxu0 %v1537_v35 }
 0x90f   :  { %2876 = vmatprep.subr.mxu0 %v3285_v0 }
 0x910   :  { %2877 = vmatpush3.msra.mxu0 %v1536_v60 }
 0x911   :  { %2878 = vmatprep.subr.mxu0 %v3285_v0 }
 0x912   :  { %2879 = vmatpush3.msra.mxu0 %v1535_v33  ;;  %v1823_v33 = vld [vmem:[#allocation16 + $0x68] sm:$0xff] }
 0x913   :  { %2880 = vmatprep.subr.mxu0 %v3285_v0 }
 0x914   :  { %2881 = vmatpush3.msra.mxu0 %v1534_v34  ;;  %v1822_v34 = vld [vmem:[#allocation16 + $0x60] sm:$0xff] }
 0x915   :  { %2920 = vmatprep.subr.mxu0 %v3285_v0 }
 0x9b5   :  { %v1437_v62 = vpop.f32.mrf.mxu0 }
 0x9b6   :  { %v1438_v63 = vadd.f32 %v2050_v61, %v1437_v62  ;;  %v1720_v61 = vld [vmem:[#allocation14 + $0x10] sm:$0xff]  ;;  %v1719_v62 = vld [vmem:[#allocation14 + $0x8] sm:$0xff] }
 0x9b7   :  { %v2814_v5 = vpop.f32.mrf.mxu0 }
 0x9b8   :  { %v1441_v32 = vmax.f32 %v1438_v63, 0.0  ;;  %v1718_v63 = vld [vmem:[#allocation14] sm:$0xff]  ;;  %v1825_v5 = vld [vmem:[#allocation16 + $0x78] sm:$0xff] }
 0x9ba   :  { %2848 = vmatmul.mubr.f32.vlgmr.msra.gmra.mxu1 %v1441_v32  ;;  %v1824_v32 = vld [vmem:[#allocation16 + $0x70] sm:$0xff] }
 0x9bb   :  { %2917 = vmatprep.mubr.msk.f32.mxu1 %vm3286_vm0, %v3285_v0  ;;  %2886 = vmatpush3.msra.mxu1 %v1641_v36  ;;  %v1821_v36 = vld [vmem:[#allocation16 + $0x58] sm:$0xff] }
 0x9bc   :  { %2887 = vmatprep.subr.mxu1 %v3285_v0 }
 0x9bd   :  { %2888 = vmatpush3.msra.mxu1 %v1640_v37  ;;  %v1820_v37 = vld [vmem:[#allocation16 + $0x50] sm:$0xff] }
 0x9be   :  { %2889 = vmatprep.subr.mxu1 %v3285_v0 }
 0x9bf   :  { %2890 = vmatpush3.msra.mxu1 %v1639_v38  ;;  %v1819_v38 = vld [vmem:[#allocation16 + $0x48] sm:$0xff] }
 0x9c0   :  { %2891 = vmatprep.subr.mxu1 %v3285_v0 }
 0x9c1   :  { %2892 = vmatpush3.msra.mxu1 %v1638_v39  ;;  %v1818_v39 = vld [vmem:[#allocation16 + $0x40] sm:$0xff] }
 0x9c2   :  { %2893 = vmatprep.subr.mxu1 %v3285_v0 }
 0x9c3   :  { %2894 = vmatpush3.msra.mxu1 %v1637_v53  ;;  %v1817_v53 = vld [vmem:[#allocation16 + $0x38] sm:$0xff] }
 0x9c4   :  { %2895 = vmatprep.subr.mxu1 %v3285_v0 }
 0x9c5   :  { %2896 = vmatpush3.msra.mxu1 %v1636_v54  ;;  %v1816_v54 = vld [vmem:[#allocation16 + $0x30] sm:$0xff] }
 0x9c6   :  { %2897 = vmatprep.subr.mxu1 %v3285_v0 }
 0x9c7   :  { %2898 = vmatpush3.msra.mxu1 %v1635_v55  ;;  %v1815_v55 = vld [vmem:[#allocation16 + $0x28] sm:$0xff] }
 0x9c8   :  { %2899 = vmatprep.subr.mxu1 %v3285_v0 }
 0x9c9   :  { %2900 = vmatpush3.msra.mxu1 %v1634_v56  ;;  %v1814_v56 = vld [vmem:[#allocation16 + $0x20] sm:$0xff] }
 0x9ca   :  { %2901 = vmatprep.subr.mxu1 %v3285_v0 }
 0x9cb   :  { %2902 = vmatpush3.msra.mxu1 %v1633_v57  ;;  %v1813_v57 = vld [vmem:[#allocation16 + $0x18] sm:$0xff] }
 0x9cc   :  { %2903 = vmatprep.subr.mxu1 %v3285_v0 }
 0x9cd   :  { %2904 = vmatpush3.msra.mxu1 %v1632_v58  ;;  %v2053_v58 = vld [vmem:[%s4143_s12 + $0x6] ss:$0 sm:$0xff] }
 0x9ce   :  { %2905 = vmatprep.subr.mxu1 %v3285_v0 }
 0x9cf   :  { %2906 = vmatpush3.msra.mxu1 %v1631_v6 }
 0x9d0   :  { %2907 = vmatprep.subr.mxu1 %v3285_v0 }
 0x9d1   :  { %2908 = vmatpush3.msra.mxu1 %v1630_v7 }
 0x9d2   :  { %2909 = vmatprep.subr.mxu1 %v3285_v0 }
 0x9d3   :  { %2910 = vmatpush3.msra.mxu1 %v1629_v8 }
 0x9d4   :  { %2911 = vmatprep.subr.mxu1 %v3285_v0 }
 0x9d5   :  { %2912 = vmatpush3.msra.mxu1 %v1628_v13 }
 0x9d6   :  { %2913 = vmatprep.subr.mxu1 %v3285_v0 }
 0x9d7   :  { %2914 = vmatpush3.msra.mxu1 %v1627_v14 }
 0x9d8   :  { %2915 = vmatprep.subr.mxu1 %v3285_v0 }
 0x9d9   :  { %2916 = vmatpush3.msra.mxu1 %v1626_v15 }
 0x9da   :  { %2955 = vmatprep.subr.mxu1 %v3285_v0 }
 0xa7a   :  { %v1529_v10 = vpop.f32.mrf.mxu1 }
 0xa7b   :  { %v1530_v11 = vadd.f32 %v2051_v9, %v1529_v10 }
 0xa7c   :  { %v2849_v12 = vpop.f32.mrf.mxu1 }
 0xa7d   :  { %1533 = vst.msk [vmem:[%s4145_s14] sm:$0xff] %vm620_vm2, %v1530_v11  ;;  %2883 = vmatmul.mubr.f32.vlgmr.msra.gmra.mxu0 %v1530_v11 }
 0xa7e   :  { %2952 = vmatprep.mubr.msk.f32.mxu0 %vm3286_vm0, %v3285_v0  ;;  %2921 = vmatpush3.msra.mxu0 %v1733_v16 }
 0xa7f   :  { %2922 = vmatprep.subr.mxu0 %v3285_v0 }
 0xa80   :  { %2923 = vmatpush3.msra.mxu0 %v1732_v17 }
 0xa81   :  { %2924 = vmatprep.subr.mxu0 %v3285_v0 }
 0xa82   :  { %2925 = vmatpush3.msra.mxu0 %v1731_v18 }
 0xa83   :  { %2926 = vmatprep.subr.mxu0 %v3285_v0 }
 0xa84   :  { %2927 = vmatpush3.msra.mxu0 %v1730_v19 }
 0xa85   :  { %2928 = vmatprep.subr.mxu0 %v3285_v0 }
 0xa86   :  { %2929 = vmatpush3.msra.mxu0 %v1729_v20 }
 0xa87   :  { %2930 = vmatprep.subr.mxu0 %v3285_v0 }
 0xa88   :  { %2931 = vmatpush3.msra.mxu0 %v1728_v21 }
 0xa89   :  { %2932 = vmatprep.subr.mxu0 %v3285_v0 }
 0xa8a   :  { %2933 = vmatpush3.msra.mxu0 %v1727_v22 }
 0xa8b   :  { %2934 = vmatprep.subr.mxu0 %v3285_v0 }
 0xa8c   :  { %2935 = vmatpush3.msra.mxu0 %v1726_v23 }
 0xa8d   :  { %2936 = vmatprep.subr.mxu0 %v3285_v0 }
 0xa8e   :  { %2937 = vmatpush3.msra.mxu0 %v1725_v24 }
 0xa8f   :  { %2938 = vmatprep.subr.mxu0 %v3285_v0 }
 0xa90   :  { %2939 = vmatpush3.msra.mxu0 %v1724_v25 }
 0xa91   :  { %2940 = vmatprep.subr.mxu0 %v3285_v0 }
 0xa92   :  { %2941 = vmatpush3.msra.mxu0 %v1723_v26 }
 0xa93   :  { %2942 = vmatprep.subr.mxu0 %v3285_v0 }
 0xa94   :  { %2943 = vmatpush3.msra.mxu0 %v1722_v27 }
 0xa95   :  { %2944 = vmatprep.subr.mxu0 %v3285_v0 }
 0xa96   :  { %2945 = vmatpush3.msra.mxu0 %v1721_v28 }
 0xa97   :  { %2946 = vmatprep.subr.mxu0 %v3285_v0 }
 0xa98   :  { %2947 = vmatpush3.msra.mxu0 %v1720_v61 }
 0xa99   :  { %2948 = vmatprep.subr.mxu0 %v3285_v0 }
 0xa9a   :  { %2949 = vmatpush3.msra.mxu0 %v1719_v62 }
 0xa9b   :  { %2950 = vmatprep.subr.mxu0 %v3285_v0 }
 0xa9c   :  { %2951 = vmatpush3.msra.mxu0 %v1718_v63 }
 0xa9d   :  { %2990 = vmatprep.subr.mxu0 %v3285_v0 }
 0xb3d   :  { %v1621_v30 = vpop.f32.mrf.mxu0 }
 0xb3e   :  { %v1622_v31 = vadd.f32 %v2052_v29, %v1621_v30 }
 0xb3f   :  { %v2884_v35 = vpop.f32.mrf.mxu0 }
 0xb40   :  { %v1625_v60 = vmax.f32 %v1622_v31, 0.0 }
 0xb42   :  { %2918 = vmatmul.mubr.f32.vlgmr.msra.gmra.mxu1 %v1625_v60 }
 0xb43   :  { %2987 = vmatprep.mubr.msk.f32.mxu1 %vm3286_vm0, %v3285_v0  ;;  %2956 = vmatpush3.msra.mxu1 %v1825_v5 }
 0xb44   :  { %2957 = vmatprep.subr.mxu1 %v3285_v0 }
 0xb45   :  { %2958 = vmatpush3.msra.mxu1 %v1824_v32 }
 0xb46   :  { %2959 = vmatprep.subr.mxu1 %v3285_v0 }
 0xb47   :  { %2960 = vmatpush3.msra.mxu1 %v1823_v33 }
 0xb48   :  { %2961 = vmatprep.subr.mxu1 %v3285_v0 }
 0xb49   :  { %2962 = vmatpush3.msra.mxu1 %v1822_v34 }
 0xb4a   :  { %2963 = vmatprep.subr.mxu1 %v3285_v0 }
 0xb4b   :  { %2964 = vmatpush3.msra.mxu1 %v1821_v36 }
 0xb4c   :  { %2965 = vmatprep.subr.mxu1 %v3285_v0 }
 0xb4d   :  { %2966 = vmatpush3.msra.mxu1 %v1820_v37 }
 0xb4e   :  { %2967 = vmatprep.subr.mxu1 %v3285_v0 }
 0xb4f   :  { %2968 = vmatpush3.msra.mxu1 %v1819_v38 }
 0xb50   :  { %2969 = vmatprep.subr.mxu1 %v3285_v0 }
 0xb51   :  { %2970 = vmatpush3.msra.mxu1 %v1818_v39 }
 0xb52   :  { %2971 = vmatprep.subr.mxu1 %v3285_v0 }
 0xb53   :  { %2972 = vmatpush3.msra.mxu1 %v1817_v53 }
 0xb54   :  { %2973 = vmatprep.subr.mxu1 %v3285_v0 }
 0xb55   :  { %2974 = vmatpush3.msra.mxu1 %v1816_v54 }
 0xb56   :  { %2975 = vmatprep.subr.mxu1 %v3285_v0 }
 0xb57   :  { %2976 = vmatpush3.msra.mxu1 %v1815_v55 }
 0xb58   :  { %2977 = vmatprep.subr.mxu1 %v3285_v0 }
 0xb59   :  { %2978 = vmatpush3.msra.mxu1 %v1814_v56 }
 0xb5a   :  { %2979 = vmatprep.subr.mxu1 %v3285_v0 }
 0xb5b   :  { %2980 = vmatpush3.msra.mxu1 %v1813_v57 }
 0xb5c   :  { %2981 = vmatprep.subr.mxu1 %v3285_v0 }
 0xc02   :  { %v1713_v6 = vpop.f32.mrf.mxu1 }
 0xc03   :  { %v1714_v7 = vadd.f32 %v2053_v58, %v1713_v6 }
 0xc04   :  { %v2919_v8 = vpop.f32.mrf.mxu1 }
 0xc05   :  { %v1717_v9 = vmax.f32 %v1714_v7, 0.0 }
 0xc07   :  { %2953 = vmatmul.mubr.f32.vlgmr.msra.gmra.mxu0 %v1717_v9 }
 0xc08   :  { %2991 = vmatpush3.msra.mxu0 %v3758_v40  ;;  %3022 = vmatprep.mubr.msk.f32.mxu0 %vm3286_vm0, %v3285_v0  ;;  %v1812_v40 = vld [vmem:[#allocation16 + $0x10] sm:$0xff] }
 0xc09   :  { %2992 = vmatprep.subr.mxu0 %v3285_v0  ;;  %2982 = vmatpush3.msra.mxu1 %v1812_v40 }
 0xc0a   :  { %2993 = vmatpush3.msra.mxu0 %v3763_v41  ;;  %2983 = vmatprep.subr.mxu1 %v3285_v0  ;;  %v1811_v41 = vld [vmem:[#allocation16 + $0x8] sm:$0xff] }
 0xc0b   :  { %2994 = vmatprep.subr.mxu0 %v3285_v0  ;;  %2984 = vmatpush3.msra.mxu1 %v1811_v41 }
 0xc0c   :  { %2995 = vmatpush3.msra.mxu0 %v3770_v42  ;;  %2985 = vmatprep.subr.mxu1 %v3285_v0  ;;  %v1810_v42 = vld [vmem:[#allocation16] sm:$0xff] }
 0xc0d   :  { %2996 = vmatprep.subr.mxu0 %v3285_v0  ;;  %2986 = vmatpush3.msra.mxu1 %v1810_v42 }
 0xc0e   :  { %2997 = vmatpush3.msra.mxu0 %v3777_v43  ;;  %v2054_v43 = vld [vmem:[%s4143_s12 + $0x7] ss:$0 sm:$0xff] }
 0xc0f   :  { %2998 = vmatprep.subr.mxu0 %v3285_v0 }
 0xc10   :  { %2999 = vmatpush3.msra.mxu0 %v3784_v44 }
 0xc11   :  { %3000 = vmatprep.subr.mxu0 %v3285_v0 }
 0xc12   :  { %3001 = vmatpush3.msra.mxu0 %v3791_v45 }
 0xc13   :  { %3002 = vmatprep.subr.mxu0 %v3285_v0 }
 0xc14   :  { %3003 = vmatpush3.msra.mxu0 %v3798_v46 }
 0xc15   :  { %3004 = vmatprep.subr.mxu0 %v3285_v0 }
 0xc16   :  { %3005 = vmatpush3.msra.mxu0 %v3805_v47 }
 0xc17   :  { %3006 = vmatprep.subr.mxu0 %v3285_v0 }
 0xc18   :  { %3007 = vmatpush3.msra.mxu0 %v3812_v48 }
 0xc19   :  { %3008 = vmatprep.subr.mxu0 %v3285_v0 }
 0xc1a   :  { %3009 = vmatpush3.msra.mxu0 %v3819_v49 }
 0xc1b   :  { %3010 = vmatprep.subr.mxu0 %v3285_v0 }
 0xc1c   :  { %3011 = vmatpush3.msra.mxu0 %v3826_v50 }
 0xc1d   :  { %3012 = vmatprep.subr.mxu0 %v3285_v0 }
 0xc1e   :  { %3013 = vmatpush3.msra.mxu0 %v3833_v51 }
 0xc1f   :  { %3014 = vmatprep.subr.mxu0 %v3285_v0 }
 0xc20   :  { %3015 = vmatpush3.msra.mxu0 %v3840_v52 }
 0xc21   :  { %3016 = vmatprep.subr.mxu0 %v3285_v0 }
 0xc22   :  { %3017 = vmatpush3.msra.mxu0 %v3897_v1 }
 0xc23   :  { %3018 = vmatprep.subr.mxu0 %v3285_v0 }
 0xc24   :  { %3019 = vmatpush3.msra.mxu0 %v3904_v2 }
 0xc25   :  { %3020 = vmatprep.subr.mxu0 %v3285_v0 }
 0xc26   :  { %3021 = vmatpush3.msra.mxu0 %v3910_v3 }
 0xcc7   :  { %v1805_v44 = vpop.f32.mrf.mxu0 }
 0xcc8   :  { %v1806_v45 = vadd.f32 %v2054_v43, %v1805_v44 }
 0xcc9   :  { %v2954_v46 = vpop.f32.mrf.mxu0 }
 0xcca   :  { %v1809_v47 = vmax.f32 %v1806_v45, 0.0 }
 0xccc   :  { %2988 = vmatmul.mubr.f32.vlgmr.msra.gmra.mxu1 %v1809_v47 }
 0xd8c   :  { %v1897_v48 = vpop.f32.mrf.mxu1 }
 0xd8d   :  { %v1898_v49 = vadd.f32 %v3918_v4, %v1897_v48 }
 0xd8e   :  { %v2989_v50 = vpop.f32.mrf.mxu1 }
 0xd8f   :  { %v1901_v51 = vmax.f32 %v1898_v49, 0.0 }
 0xd91   :  { %3023 = vmatmul.mubr.f32.vlgmr.msra.gmra.mxu0 %v1901_v51 }
 0xd92   :  { %3231 = shalt.err (!%p3228_p7)
}
 0xd93   :  { %2007 = dma.vmem_to_hbm [thread:$0]  %s2005_s21, 128, %s4146_s15, [#allocation4]  }
 0xd94   :  { %s3288_s23 = smov [#allocation18]  }
 0xd95   :  { %s2014_s2 = sshll.u32 %s3288_s23, 4  ;;  %s2015_s2 = int_to_ptr.vmem [resolvable:$true] %s2014_s2 }
 0xd96   :  { %s3240_s24 = scalar_lea.vmem %s2015_s2, 128  ;;  %p3245_p9 = scmp.lt.s32.totalorder %s2015_s2, %s2015_s2 }
 0xd97   :  { %p3241_p8 = scmp.ne.s32.totalorder %s2015_s2, %s3240_s24  ;;  %p3246_p10 = scmp.lt.s32.totalorder %s3240_s24, %s3240_s24 }
 0xd99   :  { %p3247_p11 = por %p3246_p10, %p3245_p9 }
 0xd9b   :  { %p3248_p12 = pnand %p3247_p11, %p3241_p8 }
 0xe51   :  { %v1989_v0 = vpop.f32.mrf.mxu0 }
 0xe52   :  { %v1990_v52 = vadd.f32 %v3968_v59, %v1989_v0 }
 0xe53   :  { %v3024_v1 = vpop.f32.mrf.mxu0 }
 0xe54   :  { %1993 = vst.msk [vmem:[#allocation18] sm:$0xff] %vm178_vm1, %v1990_v52 }
 0xe55   :  { %3251 = shalt.err (!%p3248_p12)
}
 0xe56   :  { %2017 = dma.vmem_to_hbm [thread:$0]  %s2015_s2, 128, %s4147_s16, [#allocation19]  }
 0xe57   :  { %3270 = dma.done.wait [#allocation4], 128  }
 0xe58   :  { %3271 = vsyncadd [#allocation4], 4294967168 }
 0xe59   :  { %3272 = dma.done.wait [#allocation19], 128  }
 0xe5a   :  { %3273 = vsyncadd [#allocation19], 4294967168 }
 0xe5b   :  { %2028 = vsyncpa [#allocation3], 1 }
 0xe5c   :  { %2029 = vsyncpa [#allocation6], 1 }
 0xe5d   :  { %2030 = vsyncpa [#allocation9], 1 }
 0xe5e   :  { %2031 = vsyncpa [#allocation12], 1 }
 0xe5f   :  { %2032 = vsyncpa [#allocation15], 1 }
 0xe60   :  { %2033 = vsyncpa [#allocation4], 1 }
 0xe61   :  { %2034 = vsyncpa [#allocation19], 1 }

</bundles_post_ra>
